<compile_context>
chip_gen: v5e
topology: v5e:2x2
jax: 0.10.0
libtpu: 0.0.40
codegen_flags: <defaults>
</compile_context>

<pallas_src>
import numpy as np
import jax
import jax.numpy as jnp
from jax.experimental import pallas as pl
from jax.experimental.pallas import tpu as pltpu

K = 3  # all layers use 3x3 kernels


# --------------------------- fused Pallas kernel -----------------------------

def _cae_fused_kernel(x_ref,
                      s1_ref, m1_ref, b1_ref,
                      s2_ref, m2_ref, b2_ref,
                      t1_ref, m3_ref, b3_ref,
                      t2_ref, m4_ref, b4_ref,
                      o_ref):
    """Whole CAE forward for one batch element (2-D (H, W*C) activations)."""
    f32 = jnp.float32

    def conv_layer(x, s_ref, m_ref, b_ref):
        # Conv2d(k=3, s=2, p=1) + bias + Hardtanh as 3 (S @ x) @ M matmuls.
        acc = None
        for tap in range(K):
            rows = jnp.dot(s_ref[tap], x, preferred_element_type=f32)
            part = jnp.dot(rows, m_ref[tap], preferred_element_type=f32)
            acc = part if acc is None else acc + part
        return jnp.clip(acc + b_ref[...], -1.0, 1.0)

    def deconv_layer(x, t_ref, m_ref, b_ref):
        # ConvTranspose2d(k=3, s=2, p=1, op=1) + bias + Hardtanh as
        # 3 T @ (x @ M) matmuls (sub-pixel: no zero-dilated tensor).
        acc = None
        for tap in range(K):
            lanes = jnp.dot(x, m_ref[tap], preferred_element_type=f32)
            part = jnp.dot(t_ref[tap], lanes, preferred_element_type=f32)
            acc = part if acc is None else acc + part
        return jnp.clip(acc + b_ref[...], -1.0, 1.0)

    x = x_ref[0]                                    # (H,   W*3)   f32
    y1 = conv_layer(x, s1_ref, m1_ref, b1_ref)      # (H/2, W/2*32)
    y2 = conv_layer(y1, s2_ref, m2_ref, b2_ref)     # (H/4, W/4*40)
    y3 = deconv_layer(y2, t1_ref, m3_ref, b3_ref)   # (H/2, W/2*32)
    # d2 has no act of its own; forward() applies output_act (Hardtanh)
    # right after -> the single clip inside deconv_layer is exactly that.
    y4 = deconv_layer(y3, t2_ref, m4_ref, b4_ref)   # (H,   W*3)
    o_ref[0] = y4.astype(o_ref.dtype)


# ---------------- host-side construction of the row-tap operators ------------

def _conv_row_mats(w, hin, win, stride, pad):
    """Conv2d weight (Cout, Cin, K, K) -> (S, M) row-tap operators.

    With X[h, w*Cin+ci] = x[ci, h, w]:
      Out[oh, ow*Cout+co] = sum_tap ((S[tap] @ X) @ M[tap])[oh, ow*Cout+co]
    equals PyTorch Conv2d(stride, pad) (without bias).
    """
    w = np.asarray(w, np.float32)
    cout, cin, k, _ = w.shape
    ho = (hin + 2 * pad - k) // stride + 1
    wo = (win + 2 * pad - k) // stride + 1
    m = np.zeros((k, win * cin, wo * cout), np.float32)
    for kh in range(k):
        for ow in range(wo):
            for kw in range(k):
                iw = stride * ow + kw - pad
                if 0 <= iw < win:
                    m[kh, iw * cin:(iw + 1) * cin,
                      ow * cout:(ow + 1) * cout] = w[:, :, kh, kw].T
    s = np.zeros((k, ho, hin), np.float32)
    for kh in range(k):
        for oh in range(ho):
            ih = stride * oh + kh - pad
            if 0 <= ih < hin:
                s[kh, oh, ih] = 1.0
    return s, m, ho, wo


def _convT_row_mats(wt, hin, win, stride, pad, out_pad):
    """ConvTranspose2d weight (Cin, Cout, K, K) -> (T, M) row-tap operators.

    With X[h, w*Cin+ci] = x[ci, h, w]:
      Out[oh, ow*Cout+co] = sum_tap (T[tap] @ (X @ M[tap]))[oh, ow*Cout+co]
    equals PyTorch ConvTranspose2d(stride, pad, output_padding) (no bias).
    """
    wt = np.asarray(wt, np.float32)
    cin, cout, k, _ = wt.shape
    ho = (hin - 1) * stride - 2 * pad + k + out_pad
    wo = (win - 1) * stride - 2 * pad + k + out_pad
    m = np.zeros((k, win * cin, wo * cout), np.float32)
    for kh in range(k):
        for iw in range(win):
            for kw in range(k):
                ow = stride * iw + kw - pad
                if 0 <= ow < wo:
                    m[kh, iw * cin:(iw + 1) * cin,
                      ow * cout:(ow + 1) * cout] = wt[:, :, kh, kw]
    t = np.zeros((k, ho, hin), np.float32)
    for kh in range(k):
        for ih in range(hin):
            oh = stride * ih + kh - pad
            if 0 <= oh < ho:
                t[kh, oh, ih] = 1.0
    return t, m, ho, wo


# --------------------------- parameters / forward ----------------------------

def _xavier_uniform(key, shape, fan_in, fan_out):
    bound = (6.0 / (fan_in + fan_out)) ** 0.5
    return jax.random.uniform(key, shape, jnp.float32, -bound, bound)


def init_params(key):
    """Raw parameters in PyTorch layouts (matches the nn.Module init)."""
    k1, k2, k3, k4 = jax.random.split(key, 4)
    p = {}
    p["e1_w"] = _xavier_uniform(k1, (32, 3, 3, 3), 3 * 9, 32 * 9)      # Conv2d
    p["e1_b"] = jnp.zeros((32,), jnp.float32)
    p["e2_w"] = _xavier_uniform(k2, (40, 32, 3, 3), 32 * 9, 40 * 9)    # Conv2d
    p["e2_b"] = jnp.zeros((40,), jnp.float32)
    p["d1_w"] = _xavier_uniform(k3, (40, 32, 3, 3), 32 * 9, 40 * 9)    # ConvT
    p["d1_b"] = jnp.zeros((32,), jnp.float32)
    p["d2_w"] = _xavier_uniform(k4, (32, 3, 3, 3), 3 * 9, 32 * 9)      # ConvT
    p["d2_b"] = jnp.zeros((3,), jnp.float32)
    return p


def prepare_params(raw, h, w):
    """One-time conversion into the fused kernel's operators (size h x w)."""
    def bias_row(b, wo):
        return np.tile(np.asarray(b, np.float32), wo)[None, :]

    p = []
    s1, m1, h1, w1 = _conv_row_mats(raw["e1_w"], h, w, 2, 1)
    p += [s1, m1, bias_row(raw["e1_b"], w1)]
    s2, m2, h2, w2 = _conv_row_mats(raw["e2_w"], h1, w1, 2, 1)
    p += [s2, m2, bias_row(raw["e2_b"], w2)]
    t1, m3, h3, w3 = _convT_row_mats(raw["d1_w"], h2, w2, 2, 1, 1)
    p += [t1, m3, bias_row(raw["d1_b"], w3)]
    t2, m4, h4, w4 = _convT_row_mats(raw["d2_w"], h3, w3, 2, 1, 1)
    p += [t2, m4, bias_row(raw["d2_b"], w4)]
    assert (h4, w4) == (h, w), (h4, w4)
    return [jnp.asarray(a) for a in p]


def cae_forward(params, x_nchw):
    """x: (N, 3, H, W) f32.  Returns (N, 3, H, W) f32 in [-1, 1]."""
    n, c, h, w = x_nchw.shape
    x2d = jnp.transpose(x_nchw, (0, 2, 3, 1)).reshape(n, h, w * c)

    def resident(a):   # full-extent block, constant index_map -> loaded once
        return pl.BlockSpec(a.shape, lambda i: (0,) * a.ndim)

    flops = 0
    bytes_accessed = 2 * n * h * w * c * 4
    for li in range(0, len(params), 3):
        sel, mat, brow = params[li], params[li + 1], params[li + 2]
        _, r_out, r_in = sel.shape
        _, kk, nn = mat.shape
        flops += n * K * 2 * (r_out * r_in * max(kk, nn)
                              + max(r_out, r_in) * kk * nn)
        bytes_accessed += (sel.size + mat.size + brow.size) * 4
    cost = pl.CostEstimate(flops=int(flops), transcendentals=0,
                           bytes_accessed=int(bytes_accessed))

    out2d = pl.pallas_call(
        _cae_fused_kernel,
        out_shape=jax.ShapeDtypeStruct((n, h, w * c), jnp.float32),
        grid=(n,),
        in_specs=[pl.BlockSpec((1, h, w * c), lambda i: (i, 0, 0))]
                 + [resident(a) for a in params],
        out_specs=pl.BlockSpec((1, h, w * c), lambda i: (i, 0, 0)),
        compiler_params=pltpu.CompilerParams(
            dimension_semantics=("parallel",)),
        cost_estimate=cost,
    )(x2d, *params)

    return jnp.transpose(out2d.reshape(n, h, w, c), (0, 3, 1, 2))


# ------------------------------ XLA reference --------------------------------

def cae_reference(raw, x):
    """Pure-XLA reference of the PyTorch forward, for validation."""
    dn = ("NCHW", "OIHW", "NCHW")
    hi = jax.lax.Precision.HIGHEST
    ht = lambda v: jnp.clip(v, -1.0, 1.0)

    def conv(x, w, b):
        y = jax.lax.conv_general_dilated(x, w, (2, 2), ((1, 1), (1, 1)),
                                         dimension_numbers=dn, precision=hi)
        return y + b.reshape(1, -1, 1, 1)

    def convT(x, wt, b):
        w = jnp.transpose(jnp.flip(wt, (2, 3)), (1, 0, 2, 3))
        y = jax.lax.conv_general_dilated(x, w, (1, 1), ((1, 2), (1, 2)),
                                         lhs_dilation=(2, 2),
                                         dimension_numbers=dn, precision=hi)
        return y + b.reshape(1, -1, 1, 1)

    e1 = ht(conv(x, raw["e1_w"], raw["e1_b"]))
    e2 = ht(conv(e1, raw["e2_w"], raw["e2_b"]))
    d1 = ht(convT(e2, raw["d1_w"], raw["d1_b"]))
    d2 = convT(d1, raw["d2_w"], raw["d2_b"])
    return ht(d2)


if __name__ == "__main__":
    key = jax.random.PRNGKey(0)
    pkey, xkey = jax.random.split(key)
    raw = init_params(pkey)

    H = W = 16
    params = prepare_params(raw, H, W)              # one-time, host side
    x = jax.random.normal(xkey, (2, 3, H, W), jnp.float32)

    out = jax.block_until_ready(jax.jit(cae_forward)(params, x))

    assert out.shape == (2, 3, H, W), out.shape
    assert bool(jnp.all(jnp.isfinite(out)))
    assert bool(jnp.all(out >= -1.0)) and bool(jnp.all(out <= 1.0))

    ref = jax.block_until_ready(cae_reference(raw, x))
    max_err = float(jnp.max(jnp.abs(out - ref)))
    assert max_err < 5e-2, max_err

    print("KERNEL_OK")
</pallas_src>

<mosaic_0001>
module attributes {stable_mosaic.version = 11 : i64} {
  func.func @_cae_fused_kernel(%arg0: i32, %arg1: memref<1x16x48xf32, #tpu.memory_space<vmem>>, %arg2: memref<3x8x16xf32, #tpu.memory_space<vmem>>, %arg3: memref<3x48x256xf32, #tpu.memory_space<vmem>>, %arg4: memref<1x256xf32, #tpu.memory_space<vmem>>, %arg5: memref<3x4x8xf32, #tpu.memory_space<vmem>>, %arg6: memref<3x256x160xf32, #tpu.memory_space<vmem>>, %arg7: memref<1x160xf32, #tpu.memory_space<vmem>>, %arg8: memref<3x8x4xf32, #tpu.memory_space<vmem>>, %arg9: memref<3x160x256xf32, #tpu.memory_space<vmem>>, %arg10: memref<1x256xf32, #tpu.memory_space<vmem>>, %arg11: memref<3x16x8xf32, #tpu.memory_space<vmem>>, %arg12: memref<3x256x48xf32, #tpu.memory_space<vmem>>, %arg13: memref<1x48xf32, #tpu.memory_space<vmem>>, %arg14: memref<1x16x48xf32, #tpu.memory_space<vmem>>) attributes {dimension_semantics = [#tpu.dimension_semantics<parallel>], iteration_bounds = array<i64: 2>, scalar_prefetch = 0 : i64, scratch_operands = 0 : i64, tpu.core_type = #tpu.core_type<tc>, window_params = [{transform_indices = @transform_0, window_bounds = array<i64: 1, 16, 48>}, {pipeline_mode = #tpu.pipeline_mode<synchronous>, transform_indices = @transform_1, window_bounds = array<i64: 3, 8, 16>}, {pipeline_mode = #tpu.pipeline_mode<synchronous>, transform_indices = @transform_2, window_bounds = array<i64: 3, 48, 256>}, {pipeline_mode = #tpu.pipeline_mode<synchronous>, transform_indices = @transform_3, window_bounds = array<i64: 1, 256>}, {pipeline_mode = #tpu.pipeline_mode<synchronous>, transform_indices = @transform_4, window_bounds = array<i64: 3, 4, 8>}, {pipeline_mode = #tpu.pipeline_mode<synchronous>, transform_indices = @transform_5, window_bounds = array<i64: 3, 256, 160>}, {pipeline_mode = #tpu.pipeline_mode<synchronous>, transform_indices = @transform_6, window_bounds = array<i64: 1, 160>}, {pipeline_mode = #tpu.pipeline_mode<synchronous>, transform_indices = @transform_7, window_bounds = array<i64: 3, 8, 4>}, {pipeline_mode = #tpu.pipeline_mode<synchronous>, transform_indices = @transform_8, window_bounds = array<i64: 3, 160, 256>}, {pipeline_mode = #tpu.pipeline_mode<synchronous>, transform_indices = @transform_9, window_bounds = array<i64: 1, 256>}, {pipeline_mode = #tpu.pipeline_mode<synchronous>, transform_indices = @transform_10, window_bounds = array<i64: 3, 16, 8>}, {pipeline_mode = #tpu.pipeline_mode<synchronous>, transform_indices = @transform_11, window_bounds = array<i64: 3, 256, 48>}, {pipeline_mode = #tpu.pipeline_mode<synchronous>, transform_indices = @transform_12, window_bounds = array<i64: 1, 48>}, {transform_indices = @transform_13, window_bounds = array<i64: 1, 16, 48>}]} {
    %c0 = arith.constant 0 : index
    %c0_0 = arith.constant 0 : index
    %c0_1 = arith.constant 0 : index
    %0 = vector.load %arg1[%c0, %c0_0, %c0_1] : memref<1x16x48xf32, #tpu.memory_space<vmem>>, vector<1x16x48xf32>
    %1 = vector.shape_cast %0 : vector<1x16x48xf32> to vector<16x48xf32>
    %c0_2 = arith.constant 0 : index
    %c0_3 = arith.constant 0 : index
    %c0_4 = arith.constant 0 : index
    %2 = vector.load %arg2[%c0_2, %c0_3, %c0_4] : memref<3x8x16xf32, #tpu.memory_space<vmem>>, vector<1x8x16xf32>
    %3 = vector.shape_cast %2 : vector<1x8x16xf32> to vector<8x16xf32>
    %cst = arith.constant dense<0.000000e+00> : vector<8x48xf32>
    %4 = tpu.matmul %3, %1, %cst {dimension_numbers = #tpu.dot_dimension_numbers<[1], [0], [0], [1], [0, 0, 1, 1], [], []>} : vector<8x16xf32>, vector<16x48xf32>, vector<8x48xf32> -> vector<8x48xf32>
    %c0_5 = arith.constant 0 : index
    %c0_6 = arith.constant 0 : index
    %c0_7 = arith.constant 0 : index
    %5 = vector.load %arg3[%c0_5, %c0_6, %c0_7] : memref<3x48x256xf32, #tpu.memory_space<vmem>>, vector<1x48x256xf32>
    %6 = vector.shape_cast %5 : vector<1x48x256xf32> to vector<48x256xf32>
    %cst_8 = arith.constant dense<0.000000e+00> : vector<8x256xf32>
    %7 = tpu.matmul %4, %6, %cst_8 {dimension_numbers = #tpu.dot_dimension_numbers<[1], [0], [0], [1], [0, 0, 1, 1], [], []>} : vector<8x48xf32>, vector<48x256xf32>, vector<8x256xf32> -> vector<8x256xf32>
    %c1 = arith.constant 1 : index
    %c0_9 = arith.constant 0 : index
    %c0_10 = arith.constant 0 : index
    %8 = vector.load %arg2[%c1, %c0_9, %c0_10] : memref<3x8x16xf32, #tpu.memory_space<vmem>>, vector<1x8x16xf32>
    %9 = vector.shape_cast %8 : vector<1x8x16xf32> to vector<8x16xf32>
    %cst_11 = arith.constant dense<0.000000e+00> : vector<8x48xf32>
    %10 = tpu.matmul %9, %1, %cst_11 {dimension_numbers = #tpu.dot_dimension_numbers<[1], [0], [0], [1], [0, 0, 1, 1], [], []>} : vector<8x16xf32>, vector<16x48xf32>, vector<8x48xf32> -> vector<8x48xf32>
    %c1_12 = arith.constant 1 : index
    %c0_13 = arith.constant 0 : index
    %c0_14 = arith.constant 0 : index
    %11 = vector.load %arg3[%c1_12, %c0_13, %c0_14] : memref<3x48x256xf32, #tpu.memory_space<vmem>>, vector<1x48x256xf32>
    %12 = vector.shape_cast %11 : vector<1x48x256xf32> to vector<48x256xf32>
    %cst_15 = arith.constant dense<0.000000e+00> : vector<8x256xf32>
    %13 = tpu.matmul %10, %12, %cst_15 {dimension_numbers = #tpu.dot_dimension_numbers<[1], [0], [0], [1], [0, 0, 1, 1], [], []>} : vector<8x48xf32>, vector<48x256xf32>, vector<8x256xf32> -> vector<8x256xf32>
    %14 = arith.addf %7, %13 : vector<8x256xf32>
    %c2 = arith.constant 2 : index
    %c0_16 = arith.constant 0 : index
    %c0_17 = arith.constant 0 : index
    %15 = vector.load %arg2[%c2, %c0_16, %c0_17] : memref<3x8x16xf32, #tpu.memory_space<vmem>>, vector<1x8x16xf32>
    %16 = vector.shape_cast %15 : vector<1x8x16xf32> to vector<8x16xf32>
    %cst_18 = arith.constant dense<0.000000e+00> : vector<8x48xf32>
    %17 = tpu.matmul %16, %1, %cst_18 {dimension_numbers = #tpu.dot_dimension_numbers<[1], [0], [0], [1], [0, 0, 1, 1], [], []>} : vector<8x16xf32>, vector<16x48xf32>, vector<8x48xf32> -> vector<8x48xf32>
    %c2_19 = arith.constant 2 : index
    %c0_20 = arith.constant 0 : index
    %c0_21 = arith.constant 0 : index
    %18 = vector.load %arg3[%c2_19, %c0_20, %c0_21] : memref<3x48x256xf32, #tpu.memory_space<vmem>>, vector<1x48x256xf32>
    %19 = vector.shape_cast %18 : vector<1x48x256xf32> to vector<48x256xf32>
    %cst_22 = arith.constant dense<0.000000e+00> : vector<8x256xf32>
    %20 = tpu.matmul %17, %19, %cst_22 {dimension_numbers = #tpu.dot_dimension_numbers<[1], [0], [0], [1], [0, 0, 1, 1], [], []>} : vector<8x48xf32>, vector<48x256xf32>, vector<8x256xf32> -> vector<8x256xf32>
    %21 = arith.addf %14, %20 : vector<8x256xf32>
    %c0_23 = arith.constant 0 : index
    %c0_24 = arith.constant 0 : index
    %22 = vector.load %arg4[%c0_23, %c0_24] : memref<1x256xf32, #tpu.memory_space<vmem>>, vector<1x256xf32>
    %23 = vector.broadcast %22 : vector<1x256xf32> to vector<8x256xf32>
    %24 = arith.addf %21, %23 : vector<8x256xf32>
    %cst_25 = arith.constant -1.000000e+00 : f32
    %cst_26 = arith.constant 1.000000e+00 : f32
    %25 = vector.broadcast %cst_25 : f32 to vector<8x256xf32>
    %26 = arith.maximumf %25, %24 : vector<8x256xf32>
    %27 = vector.broadcast %cst_26 : f32 to vector<8x256xf32>
    %28 = arith.minimumf %27, %26 : vector<8x256xf32>
    %c0_27 = arith.constant 0 : index
    %c0_28 = arith.constant 0 : index
    %c0_29 = arith.constant 0 : index
    %29 = vector.load %arg5[%c0_27, %c0_28, %c0_29] : memref<3x4x8xf32, #tpu.memory_space<vmem>>, vector<1x4x8xf32>
    %30 = vector.shape_cast %29 : vector<1x4x8xf32> to vector<4x8xf32>
    %cst_30 = arith.constant dense<0.000000e+00> : vector<4x256xf32>
    %31 = tpu.matmul %30, %28, %cst_30 {dimension_numbers = #tpu.dot_dimension_numbers<[1], [0], [0], [1], [0, 0, 1, 1], [], []>} : vector<4x8xf32>, vector<8x256xf32>, vector<4x256xf32> -> vector<4x256xf32>
    %c0_31 = arith.constant 0 : index
    %c0_32 = arith.constant 0 : index
    %c0_33 = arith.constant 0 : index
    %32 = vector.load %arg6[%c0_31, %c0_32, %c0_33] : memref<3x256x160xf32, #tpu.memory_space<vmem>>, vector<1x256x160xf32>
    %33 = vector.shape_cast %32 : vector<1x256x160xf32> to vector<256x160xf32>
    %cst_34 = arith.constant dense<0.000000e+00> : vector<4x160xf32>
    %34 = tpu.matmul %31, %33, %cst_34 {dimension_numbers = #tpu.dot_dimension_numbers<[1], [0], [0], [1], [0, 0, 1, 1], [], []>} : vector<4x256xf32>, vector<256x160xf32>, vector<4x160xf32> -> vector<4x160xf32>
    %c1_35 = arith.constant 1 : index
    %c0_36 = arith.constant 0 : index
    %c0_37 = arith.constant 0 : index
    %35 = vector.load %arg5[%c1_35, %c0_36, %c0_37] : memref<3x4x8xf32, #tpu.memory_space<vmem>>, vector<1x4x8xf32>
    %36 = vector.shape_cast %35 : vector<1x4x8xf32> to vector<4x8xf32>
    %cst_38 = arith.constant dense<0.000000e+00> : vector<4x256xf32>
    %37 = tpu.matmul %36, %28, %cst_38 {dimension_numbers = #tpu.dot_dimension_numbers<[1], [0], [0], [1], [0, 0, 1, 1], [], []>} : vector<4x8xf32>, vector<8x256xf32>, vector<4x256xf32> -> vector<4x256xf32>
    %c1_39 = arith.constant 1 : index
    %c0_40 = arith.constant 0 : index
    %c0_41 = arith.constant 0 : index
    %38 = vector.load %arg6[%c1_39, %c0_40, %c0_41] : memref<3x256x160xf32, #tpu.memory_space<vmem>>, vector<1x256x160xf32>
    %39 = vector.shape_cast %38 : vector<1x256x160xf32> to vector<256x160xf32>
    %cst_42 = arith.constant dense<0.000000e+00> : vector<4x160xf32>
    %40 = tpu.matmul %37, %39, %cst_42 {dimension_numbers = #tpu.dot_dimension_numbers<[1], [0], [0], [1], [0, 0, 1, 1], [], []>} : vector<4x256xf32>, vector<256x160xf32>, vector<4x160xf32> -> vector<4x160xf32>
    %41 = arith.addf %34, %40 : vector<4x160xf32>
    %c2_43 = arith.constant 2 : index
    %c0_44 = arith.constant 0 : index
    %c0_45 = arith.constant 0 : index
    %42 = vector.load %arg5[%c2_43, %c0_44, %c0_45] : memref<3x4x8xf32, #tpu.memory_space<vmem>>, vector<1x4x8xf32>
    %43 = vector.shape_cast %42 : vector<1x4x8xf32> to vector<4x8xf32>
    %cst_46 = arith.constant dense<0.000000e+00> : vector<4x256xf32>
    %44 = tpu.matmul %43, %28, %cst_46 {dimension_numbers = #tpu.dot_dimension_numbers<[1], [0], [0], [1], [0, 0, 1, 1], [], []>} : vector<4x8xf32>, vector<8x256xf32>, vector<4x256xf32> -> vector<4x256xf32>
    %c2_47 = arith.constant 2 : index
    %c0_48 = arith.constant 0 : index
    %c0_49 = arith.constant 0 : index
    %45 = vector.load %arg6[%c2_47, %c0_48, %c0_49] : memref<3x256x160xf32, #tpu.memory_space<vmem>>, vector<1x256x160xf32>
    %46 = vector.shape_cast %45 : vector<1x256x160xf32> to vector<256x160xf32>
    %cst_50 = arith.constant dense<0.000000e+00> : vector<4x160xf32>
    %47 = tpu.matmul %44, %46, %cst_50 {dimension_numbers = #tpu.dot_dimension_numbers<[1], [0], [0], [1], [0, 0, 1, 1], [], []>} : vector<4x256xf32>, vector<256x160xf32>, vector<4x160xf32> -> vector<4x160xf32>
    %48 = arith.addf %41, %47 : vector<4x160xf32>
    %c0_51 = arith.constant 0 : index
    %c0_52 = arith.constant 0 : index
    %49 = vector.load %arg7[%c0_51, %c0_52] : memref<1x160xf32, #tpu.memory_space<vmem>>, vector<1x160xf32>
    %50 = vector.broadcast %49 : vector<1x160xf32> to vector<4x160xf32>
    %51 = arith.addf %48, %50 : vector<4x160xf32>
    %cst_53 = arith.constant -1.000000e+00 : f32
    %cst_54 = arith.constant 1.000000e+00 : f32
    %52 = vector.broadcast %cst_53 : f32 to vector<4x160xf32>
    %53 = arith.maximumf %52, %51 : vector<4x160xf32>
    %54 = vector.broadcast %cst_54 : f32 to vector<4x160xf32>
    %55 = arith.minimumf %54, %53 : vector<4x160xf32>
    %c0_55 = arith.constant 0 : index
    %c0_56 = arith.constant 0 : index
    %c0_57 = arith.constant 0 : index
    %56 = vector.load %arg9[%c0_55, %c0_56, %c0_57] : memref<3x160x256xf32, #tpu.memory_space<vmem>>, vector<1x160x256xf32>
    %57 = vector.shape_cast %56 : vector<1x160x256xf32> to vector<160x256xf32>
    %cst_58 = arith.constant dense<0.000000e+00> : vector<4x256xf32>
    %58 = tpu.matmul %55, %57, %cst_58 {dimension_numbers = #tpu.dot_dimension_numbers<[1], [0], [0], [1], [0, 0, 1, 1], [], []>} : vector<4x160xf32>, vector<160x256xf32>, vector<4x256xf32> -> vector<4x256xf32>
    %c0_59 = arith.constant 0 : index
    %c0_60 = arith.constant 0 : index
    %c0_61 = arith.constant 0 : index
    %59 = vector.load %arg8[%c0_59, %c0_60, %c0_61] : memref<3x8x4xf32, #tpu.memory_space<vmem>>, vector<1x8x4xf32>
    %60 = vector.shape_cast %59 : vector<1x8x4xf32> to vector<8x4xf32>
    %cst_62 = arith.constant dense<0.000000e+00> : vector<8x256xf32>
    %61 = tpu.matmul %60, %58, %cst_62 {dimension_numbers = #tpu.dot_dimension_numbers<[1], [0], [0], [1], [0, 0, 1, 1], [], []>} : vector<8x4xf32>, vector<4x256xf32>, vector<8x256xf32> -> vector<8x256xf32>
    %c1_63 = arith.constant 1 : index
    %c0_64 = arith.constant 0 : index
    %c0_65 = arith.constant 0 : index
    %62 = vector.load %arg9[%c1_63, %c0_64, %c0_65] : memref<3x160x256xf32, #tpu.memory_space<vmem>>, vector<1x160x256xf32>
    %63 = vector.shape_cast %62 : vector<1x160x256xf32> to vector<160x256xf32>
    %cst_66 = arith.constant dense<0.000000e+00> : vector<4x256xf32>
    %64 = tpu.matmul %55, %63, %cst_66 {dimension_numbers = #tpu.dot_dimension_numbers<[1], [0], [0], [1], [0, 0, 1, 1], [], []>} : vector<4x160xf32>, vector<160x256xf32>, vector<4x256xf32> -> vector<4x256xf32>
    %c1_67 = arith.constant 1 : index
    %c0_68 = arith.constant 0 : index
    %c0_69 = arith.constant 0 : index
    %65 = vector.load %arg8[%c1_67, %c0_68, %c0_69] : memref<3x8x4xf32, #tpu.memory_space<vmem>>, vector<1x8x4xf32>
    %66 = vector.shape_cast %65 : vector<1x8x4xf32> to vector<8x4xf32>
    %cst_70 = arith.constant dense<0.000000e+00> : vector<8x256xf32>
    %67 = tpu.matmul %66, %64, %cst_70 {dimension_numbers = #tpu.dot_dimension_numbers<[1], [0], [0], [1], [0, 0, 1, 1], [], []>} : vector<8x4xf32>, vector<4x256xf32>, vector<8x256xf32> -> vector<8x256xf32>
    %68 = arith.addf %61, %67 : vector<8x256xf32>
    %c2_71 = arith.constant 2 : index
    %c0_72 = arith.constant 0 : index
    %c0_73 = arith.constant 0 : index
    %69 = vector.load %arg9[%c2_71, %c0_72, %c0_73] : memref<3x160x256xf32, #tpu.memory_space<vmem>>, vector<1x160x256xf32>
    %70 = vector.shape_cast %69 : vector<1x160x256xf32> to vector<160x256xf32>
    %cst_74 = arith.constant dense<0.000000e+00> : vector<4x256xf32>
    %71 = tpu.matmul %55, %70, %cst_74 {dimension_numbers = #tpu.dot_dimension_numbers<[1], [0], [0], [1], [0, 0, 1, 1], [], []>} : vector<4x160xf32>, vector<160x256xf32>, vector<4x256xf32> -> vector<4x256xf32>
    %c2_75 = arith.constant 2 : index
    %c0_76 = arith.constant 0 : index
    %c0_77 = arith.constant 0 : index
    %72 = vector.load %arg8[%c2_75, %c0_76, %c0_77] : memref<3x8x4xf32, #tpu.memory_space<vmem>>, vector<1x8x4xf32>
    %73 = vector.shape_cast %72 : vector<1x8x4xf32> to vector<8x4xf32>
    %cst_78 = arith.constant dense<0.000000e+00> : vector<8x256xf32>
    %74 = tpu.matmul %73, %71, %cst_78 {dimension_numbers = #tpu.dot_dimension_numbers<[1], [0], [0], [1], [0, 0, 1, 1], [], []>} : vector<8x4xf32>, vector<4x256xf32>, vector<8x256xf32> -> vector<8x256xf32>
    %75 = arith.addf %68, %74 : vector<8x256xf32>
    %c0_79 = arith.constant 0 : index
    %c0_80 = arith.constant 0 : index
    %76 = vector.load %arg10[%c0_79, %c0_80] : memref<1x256xf32, #tpu.memory_space<vmem>>, vector<1x256xf32>
    %77 = vector.broadcast %76 : vector<1x256xf32> to vector<8x256xf32>
    %78 = arith.addf %75, %77 : vector<8x256xf32>
    %cst_81 = arith.constant -1.000000e+00 : f32
    %cst_82 = arith.constant 1.000000e+00 : f32
    %79 = vector.broadcast %cst_81 : f32 to vector<8x256xf32>
    %80 = arith.maximumf %79, %78 : vector<8x256xf32>
    %81 = vector.broadcast %cst_82 : f32 to vector<8x256xf32>
    %82 = arith.minimumf %81, %80 : vector<8x256xf32>
    %c0_83 = arith.constant 0 : index
    %c0_84 = arith.constant 0 : index
    %c0_85 = arith.constant 0 : index
    %83 = vector.load %arg12[%c0_83, %c0_84, %c0_85] : memref<3x256x48xf32, #tpu.memory_space<vmem>>, vector<1x256x48xf32>
    %84 = vector.shape_cast %83 : vector<1x256x48xf32> to vector<256x48xf32>
    %cst_86 = arith.constant dense<0.000000e+00> : vector<8x48xf32>
    %85 = tpu.matmul %82, %84, %cst_86 {dimension_numbers = #tpu.dot_dimension_numbers<[1], [0], [0], [1], [0, 0, 1, 1], [], []>} : vector<8x256xf32>, vector<256x48xf32>, vector<8x48xf32> -> vector<8x48xf32>
    %c0_87 = arith.constant 0 : index
    %c0_88 = arith.constant 0 : index
    %c0_89 = arith.constant 0 : index
    %86 = vector.load %arg11[%c0_87, %c0_88, %c0_89] : memref<3x16x8xf32, #tpu.memory_space<vmem>>, vector<1x16x8xf32>
    %87 = vector.shape_cast %86 : vector<1x16x8xf32> to vector<16x8xf32>
    %cst_90 = arith.constant dense<0.000000e+00> : vector<16x48xf32>
    %88 = tpu.matmul %87, %85, %cst_90 {dimension_numbers = #tpu.dot_dimension_numbers<[1], [0], [0], [1], [0, 0, 1, 1], [], []>} : vector<16x8xf32>, vector<8x48xf32>, vector<16x48xf32> -> vector<16x48xf32>
    %c1_91 = arith.constant 1 : index
    %c0_92 = arith.constant 0 : index
    %c0_93 = arith.constant 0 : index
    %89 = vector.load %arg12[%c1_91, %c0_92, %c0_93] : memref<3x256x48xf32, #tpu.memory_space<vmem>>, vector<1x256x48xf32>
    %90 = vector.shape_cast %89 : vector<1x256x48xf32> to vector<256x48xf32>
    %cst_94 = arith.constant dense<0.000000e+00> : vector<8x48xf32>
    %91 = tpu.matmul %82, %90, %cst_94 {dimension_numbers = #tpu.dot_dimension_numbers<[1], [0], [0], [1], [0, 0, 1, 1], [], []>} : vector<8x256xf32>, vector<256x48xf32>, vector<8x48xf32> -> vector<8x48xf32>
    %c1_95 = arith.constant 1 : index
    %c0_96 = arith.constant 0 : index
    %c0_97 = arith.constant 0 : index
    %92 = vector.load %arg11[%c1_95, %c0_96, %c0_97] : memref<3x16x8xf32, #tpu.memory_space<vmem>>, vector<1x16x8xf32>
    %93 = vector.shape_cast %92 : vector<1x16x8xf32> to vector<16x8xf32>
    %cst_98 = arith.constant dense<0.000000e+00> : vector<16x48xf32>
    %94 = tpu.matmul %93, %91, %cst_98 {dimension_numbers = #tpu.dot_dimension_numbers<[1], [0], [0], [1], [0, 0, 1, 1], [], []>} : vector<16x8xf32>, vector<8x48xf32>, vector<16x48xf32> -> vector<16x48xf32>
    %95 = arith.addf %88, %94 : vector<16x48xf32>
    %c2_99 = arith.constant 2 : index
    %c0_100 = arith.constant 0 : index
    %c0_101 = arith.constant 0 : index
    %96 = vector.load %arg12[%c2_99, %c0_100, %c0_101] : memref<3x256x48xf32, #tpu.memory_space<vmem>>, vector<1x256x48xf32>
    %97 = vector.shape_cast %96 : vector<1x256x48xf32> to vector<256x48xf32>
    %cst_102 = arith.constant dense<0.000000e+00> : vector<8x48xf32>
    %98 = tpu.matmul %82, %97, %cst_102 {dimension_numbers = #tpu.dot_dimension_numbers<[1], [0], [0], [1], [0, 0, 1, 1], [], []>} : vector<8x256xf32>, vector<256x48xf32>, vector<8x48xf32> -> vector<8x48xf32>
    %c2_103 = arith.constant 2 : index
    %c0_104 = arith.constant 0 : index
    %c0_105 = arith.constant 0 : index
    %99 = vector.load %arg11[%c2_103, %c0_104, %c0_105] : memref<3x16x8xf32, #tpu.memory_space<vmem>>, vector<1x16x8xf32>
    %100 = vector.shape_cast %99 : vector<1x16x8xf32> to vector<16x8xf32>
    %cst_106 = arith.constant dense<0.000000e+00> : vector<16x48xf32>
    %101 = tpu.matmul %100, %98, %cst_106 {dimension_numbers = #tpu.dot_dimension_numbers<[1], [0], [0], [1], [0, 0, 1, 1], [], []>} : vector<16x8xf32>, vector<8x48xf32>, vector<16x48xf32> -> vector<16x48xf32>
    %102 = arith.addf %95, %101 : vector<16x48xf32>
    %c0_107 = arith.constant 0 : index
    %c0_108 = arith.constant 0 : index
    %103 = vector.load %arg13[%c0_107, %c0_108] : memref<1x48xf32, #tpu.memory_space<vmem>>, vector<1x48xf32>
    %104 = vector.broadcast %103 : vector<1x48xf32> to vector<16x48xf32>
    %105 = arith.addf %102, %104 : vector<16x48xf32>
    %cst_109 = arith.constant -1.000000e+00 : f32
    %cst_110 = arith.constant 1.000000e+00 : f32
    %106 = vector.broadcast %cst_109 : f32 to vector<16x48xf32>
    %107 = arith.maximumf %106, %105 : vector<16x48xf32>
    %108 = vector.broadcast %cst_110 : f32 to vector<16x48xf32>
    %109 = arith.minimumf %108, %107 : vector<16x48xf32>
    %c0_111 = arith.constant 0 : index
    %c0_112 = arith.constant 0 : index
    %c0_113 = arith.constant 0 : index
    %110 = vector.load %arg14[%c0_111, %c0_112, %c0_113] : memref<1x16x48xf32, #tpu.memory_space<vmem>>, vector<1x16x48xf32>
    %111 = vector.shape_cast %110 : vector<1x16x48xf32> to vector<16x48xf32>
    %112 = vector.shape_cast %109 : vector<16x48xf32> to vector<1x16x48xf32>
    tpu.vector_store %arg14[%c0_111, %c0_112, %c0_113], %112 {strides = array<i32>} : memref<1x16x48xf32, #tpu.memory_space<vmem>>, vector<1x16x48xf32>,
    return
  }
  func.func @transform_0(%arg0: i32) -> (i32, i32, i32) {
    %c0_i32 = arith.constant 0 : i32
    %c0_i32_0 = arith.constant 0 : i32
    %c0_i32_1 = arith.constant 0 : i32
    return %arg0, %c0_i32, %c0_i32_0 : i32, i32, i32
  }
  func.func @transform_1(%arg0: i32) -> (i32, i32, i32) {
    %c0_i32 = arith.constant 0 : i32
    %c0_i32_0 = arith.constant 0 : i32
    %c0_i32_1 = arith.constant 0 : i32
    %c0_i32_2 = arith.constant 0 : i32
    return %c0_i32, %c0_i32_0, %c0_i32_1 : i32, i32, i32
  }
  func.func @transform_2(%arg0: i32) -> (i32, i32, i32) {
    %c0_i32 = arith.constant 0 : i32
    %c0_i32_0 = arith.constant 0 : i32
    %c0_i32_1 = arith.constant 0 : i32
    %c0_i32_2 = arith.constant 0 : i32
    return %c0_i32, %c0_i32_0, %c0_i32_1 : i32, i32, i32
  }
  func.func @transform_3(%arg0: i32) -> (i32, i32) {
    %c0_i32 = arith.constant 0 : i32
    %c0_i32_0 = arith.constant 0 : i32
    %c0_i32_1 = arith.constant 0 : i32
    return %c0_i32, %c0_i32_0 : i32, i32
  }
  func.func @transform_4(%arg0: i32) -> (i32, i32, i32) {
    %c0_i32 = arith.constant 0 : i32
    %c0_i32_0 = arith.constant 0 : i32
    %c0_i32_1 = arith.constant 0 : i32
    %c0_i32_2 = arith.constant 0 : i32
    return %c0_i32, %c0_i32_0, %c0_i32_1 : i32, i32, i32
  }
  func.func @transform_5(%arg0: i32) -> (i32, i32, i32) {
    %c0_i32 = arith.constant 0 : i32
    %c0_i32_0 = arith.constant 0 : i32
    %c0_i32_1 = arith.constant 0 : i32
    %c0_i32_2 = arith.constant 0 : i32
    return %c0_i32, %c0_i32_0, %c0_i32_1 : i32, i32, i32
  }
  func.func @transform_6(%arg0: i32) -> (i32, i32) {
    %c0_i32 = arith.constant 0 : i32
    %c0_i32_0 = arith.constant 0 : i32
    %c0_i32_1 = arith.constant 0 : i32
    return %c0_i32, %c0_i32_0 : i32, i32
  }
  func.func @transform_7(%arg0: i32) -> (i32, i32, i32) {
    %c0_i32 = arith.constant 0 : i32
    %c0_i32_0 = arith.constant 0 : i32
    %c0_i32_1 = arith.constant 0 : i32
    %c0_i32_2 = arith.constant 0 : i32
    return %c0_i32, %c0_i32_0, %c0_i32_1 : i32, i32, i32
  }
  func.func @transform_8(%arg0: i32) -> (i32, i32, i32) {
    %c0_i32 = arith.constant 0 : i32
    %c0_i32_0 = arith.constant 0 : i32
    %c0_i32_1 = arith.constant 0 : i32
    %c0_i32_2 = arith.constant 0 : i32
    return %c0_i32, %c0_i32_0, %c0_i32_1 : i32, i32, i32
  }
  func.func @transform_9(%arg0: i32) -> (i32, i32) {
    %c0_i32 = arith.constant 0 : i32
    %c0_i32_0 = arith.constant 0 : i32
    %c0_i32_1 = arith.constant 0 : i32
    return %c0_i32, %c0_i32_0 : i32, i32
  }
  func.func @transform_10(%arg0: i32) -> (i32, i32, i32) {
    %c0_i32 = arith.constant 0 : i32
    %c0_i32_0 = arith.constant 0 : i32
    %c0_i32_1 = arith.constant 0 : i32
    %c0_i32_2 = arith.constant 0 : i32
    return %c0_i32, %c0_i32_0, %c0_i32_1 : i32, i32, i32
  }
  func.func @transform_11(%arg0: i32) -> (i32, i32, i32) {
    %c0_i32 = arith.constant 0 : i32
    %c0_i32_0 = arith.constant 0 : i32
    %c0_i32_1 = arith.constant 0 : i32
    %c0_i32_2 = arith.constant 0 : i32
    return %c0_i32, %c0_i32_0, %c0_i32_1 : i32, i32, i32
  }
  func.func @transform_12(%arg0: i32) -> (i32, i32) {
    %c0_i32 = arith.constant 0 : i32
    %c0_i32_0 = arith.constant 0 : i32
    %c0_i32_1 = arith.constant 0 : i32
    return %c0_i32, %c0_i32_0 : i32, i32
  }
  func.func @transform_13(%arg0: i32) -> (i32, i32, i32) {
    %c0_i32 = arith.constant 0 : i32
    %c0_i32_0 = arith.constant 0 : i32
    %c0_i32_1 = arith.constant 0 : i32
    return %arg0, %c0_i32, %c0_i32_0 : i32, i32, i32
  }
}

</mosaic_0001>

<bundles_post_ra>
// kernel: cae_forward.1
= control target key start
LH: loop header
LB: loop body
LE: loop exit
PB: predicated region body
PF: predicated region fallthrough
CT: control target
= control target key end

     0   :  { %s2652_s25 = smov 0   ;;  %s4151_s0 = inlined_call_operand.vmem [shape: f32[2,16,48], index: 0, kind: input, shape index: {}]   ;;  %s4152_s1 = inlined_call_operand.vmem [shape: f32[3,8,16], index: 1, kind: input, shape index: {}]   ;;  %s4153_s2 = inlined_call_operand.vmem [shape: f32[3,48,256], index: 2, kind: input, shape index: {}]   ;;  %s4154_s3 = inlined_call_operand.vmem [shape: f32[1,256], index: 3, kind: input, shape index: {}]   ;;  %s4155_s4 = inlined_call_operand.vmem [shape: f32[3,4,8], index: 4, kind: input, shape index: {}]   ;;  %s4156_s5 = inlined_call_operand.vmem [shape: f32[3,256,160], index: 5, kind: input, shape index: {}]   ;;  %s4157_s6 = inlined_call_operand.vmem [shape: f32[1,160], index: 6, kind: input, shape index: {}]   ;;  %s4158_s7 = inlined_call_operand.vmem [shape: f32[3,8,4], index: 7, kind: input, shape index: {}]   ;;  %s4159_s8 = inlined_call_operand.vmem [shape: f32[3,160,256], index: 8, kind: input, shape index: {}]   ;;  %s4160_s9 = inlined_call_operand.vmem [shape: f32[1,256], index: 9, kind: input, shape index: {}]   ;;  %s4161_s10 = inlined_call_operand.vmem [shape: f32[3,16,8], index: 10, kind: input, shape index: {}]   ;;  %s4162_s11 = inlined_call_operand.vmem [shape: f32[3,256,48], index: 11, kind: input, shape index: {}]   ;;  %s4163_s12 = inlined_call_operand.vmem [shape: f32[1,48], index: 12, kind: input, shape index: {}]   ;;  %s4164_s13 = inlined_call_operand.vmem [shape: f32[2,16,48], index: 13, kind: output, shape index: {}]  }
   0x1 LB: > { %s2199_s26 = sadd.s32 4294967295, %s2580_s25   ;;  %p2203_p0 = scmp.ge.s32.totalorder %s2580_s25, 1  ;;  %s2580_s25 = sphi %s2652_s25, %s23_s25  }
   0x2   : > { %p387_p1 = scmp.lt.s32.totalorder %s2580_s25, 3 }
   0x4   : > { %p388_p2 = pnand %p2203_p0, %p387_p1 }
   0x5   : > { %p431_p3 = scmp.lt.s32.totalorder (!%p388_p2), %s2199_s26, 1 }
   0x6   : > { %391 = sbr.rel (%p388_p2) target bundleno = 1631 (0x65f), region = 72 }
   0xb   : > { %v2222_v0 = vld [vmem:[%s4153_s2 + $0xb8] sm:$0xff]  ;;  %s4166_s26 = smov (!%p431_p3, %s2199_s26), 1  ;;  %v2220_v1 = vld [vmem:[%s4153_s2 + $0xa8] sm:$0xff]  ;;  %vm444_vm0 = vcmask 130048   ;;  %v2227_v7 = vld [vmem:[%s4152_s1 + $0x10] sm:$0xff]  ;;  %vm518_vm1 = vcmask 392192  }
   0xc   : > { %552 = vmatpush.msra.mxu3 %v2222_v0  ;;  %v2218_v2 = vld [vmem:[%s4153_s2 + $0x98] sm:$0xff]  ;;  %s2563_s16 = sshll.u32 %s4166_s26, 4  ;;  %v2216_v3 = vld [vmem:[%s4153_s2 + $0x88] sm:$0xff]  ;;  %v443_v9 = vld [vmem:[%s4152_s1] sm:$0xff]  ;;  %vm701_vm2 = vcmask 64512   ;;  %vm1323_vm3 = vcmask 261120  }
   0xd   : > { %s435_s19 = scalar_lea.vmem %s4151_s0, %s2563_s16  ;;  %v2209_v6 = vld [vmem:[%s4152_s1 + $0x8] sm:$0xff]  ;;  %v2214_v8 = vld [vmem:[%s4153_s2 + $0x78] sm:$0xff]  ;;  %v2221_v11 = vld [vmem:[%s4153_s2 + $0xb0] sm:$0xff]  ;;  %vm1535_vm4 = vcmask 1043456   ;;  %vm1531_vm5 = vcmask 31744   ;;  %s440_s18 = scalar_lea.vmem %s4164_s13, %s2563_s16 }
   0xe   : > { %553 = vmatpush.msra.mxu3 %v2220_v1  ;;  %v442_v4 = vld [vmem:[%s435_s19 + $0x8] sm:$0xff]  ;;  %v441_v5 = vld [vmem:[%s435_s19] sm:$0xff]  ;;  %v479_v10 = vld [vmem:[%s4153_s2 + $0x58] sm:$0xff] }
   0xf   : > { %499 = vmatpush.msra.mxu1 %v442_v4  ;;  %624 = vmatpush.msra.mxu2 %v442_v4  ;;  %v2212_v12 = vld [vmem:[%s4153_s2 + $0x68] sm:$0xff]  ;;  %v2239_v14 = vld [vmem:[%s4153_s2 + $0x110] sm:$0xff]  ;;  %v2219_v15 = vld [vmem:[%s4153_s2 + $0xa0] sm:$0xff] }
  0x10   : > { %554 = vmatpush.msra.mxu3 %v2218_v2  ;;  %462 = vmatpush.msra.mxu0 %v442_v4  ;;  %v477_v13 = vld [vmem:[%s4153_s2 + $0x48] sm:$0xff]  ;;  %v2217_v16 = vld [vmem:[%s4153_s2 + $0x90] sm:$0xff]  ;;  %v2215_v17 = vld [vmem:[%s4153_s2 + $0x80] sm:$0xff] }
  0x11   : > { %500 = vmatpush.msra.mxu1 %v441_v5  ;;  %625 = vmatpush.msra.mxu2 %v441_v5  ;;  %v2213_v18 = vld [vmem:[%s4153_s2 + $0x70] sm:$0xff]  ;;  %v2211_v19 = vld [vmem:[%s4153_s2 + $0x60] sm:$0xff]  ;;  %v475_v23 = vld [vmem:[%s4153_s2 + $0x38] sm:$0xff] }
  0x12   : > { %555 = vmatpush.msra.mxu3 %v2216_v3  ;;  %2210 = vmatmul.msk.f32.vlgmr.msra.gmra.mxu1 %vm444_vm0, %v2209_v6  ;;  %v478_v20 = vld [vmem:[%s4153_s2 + $0x50] sm:$0xff]  ;;  %v476_v21 = vld [vmem:[%s4153_s2 + $0x40] sm:$0xff]  ;;  %v473_v26 = vld [vmem:[%s4153_s2 + $0x28] sm:$0xff] }
  0x13   : > { %2228 = vmatmul.msk.f32.vlgmr.msra.gmra.mxu2 %vm444_vm0, %v2227_v7  ;;  %463 = vmatpush.msra.mxu0 %v441_v5  ;;  %v474_v22 = vld [vmem:[%s4153_s2 + $0x30] sm:$0xff]  ;;  %v2237_v24 = vld [vmem:[%s4153_s2 + $0x100] sm:$0xff]  ;;  %v471_v29 = vld [vmem:[%s4153_s2 + $0x18] sm:$0xff] }
  0x14   : > { %556 = vmatpush.msra.mxu3 %v2214_v8  ;;  %2208 = vmatmul.msk.f32.vlgmr.msra.gmra.mxu0 %vm444_vm0, %v443_v9  ;;  %v472_v25 = vld [vmem:[%s4153_s2 + $0x20] sm:$0xff]  ;;  %v2235_v27 = vld [vmem:[%s4153_s2 + $0xf0] sm:$0xff]  ;;  %v469_v32 = vld [vmem:[%s4153_s2 + $0x8] sm:$0xff] }
  0x15   : > { %595 = vmatpush.msrb.mxu1 %v479_v10  ;;  %532 = vmatpush.msrb.mxu0 %v2221_v11  ;;  %v470_v28 = vld [vmem:[%s4153_s2 + $0x10] sm:$0xff]  ;;  %v2233_v30 = vld [vmem:[%s4153_s2 + $0xe0] sm:$0xff]  ;;  %v2240_v35 = vld [vmem:[%s4153_s2 + $0x118] sm:$0xff] }
  0x16   : > { %557 = vmatpush.msra.mxu3 %v2212_v12  ;;  %v468_v31 = vld [vmem:[%s4153_s2] sm:$0xff]  ;;  %v2231_v33 = vld [vmem:[%s4153_s2 + $0xd0] sm:$0xff]  ;;  %v2238_v37 = vld [vmem:[%s4153_s2 + $0x108] sm:$0xff] }
  0x17   : > { %596 = vmatpush.msrb.mxu1 %v477_v13  ;;  %533 = vmatpush.msrb.mxu0 %v2219_v15  ;;  %v2229_v34 = vld [vmem:[%s4153_s2 + $0xc0] sm:$0xff]  ;;  %v2236_v39 = vld [vmem:[%s4153_s2 + $0xf8] sm:$0xff]  ;;  %v2234_v40 = vld [vmem:[%s4153_s2 + $0xe8] sm:$0xff] }
  0x18   : > { %656 = vmatpush.msrb.mxu3 %v2239_v14  ;;  %v2232_v42 = vld [vmem:[%s4153_s2 + $0xd8] sm:$0xff]  ;;  %v2230_v43 = vld [vmem:[%s4153_s2 + $0xc8] sm:$0xff]  ;;  %v2280_v45 = vld [vmem:[%s4156_s5 + $0x2f0] sm:$0xff] }
  0x19   : > { %534 = vmatpush.msrb.mxu0 %v2217_v16  ;;  %597 = vmatpush.msrb.mxu1 %v475_v23  ;;  %v2278_v46 = vld [vmem:[%s4156_s5 + $0x2e0] sm:$0xff]  ;;  %v2276_v47 = vld [vmem:[%s4156_s5 + $0x2d0] sm:$0xff]  ;;  %v2313_v49 = vld [vmem:[%s4156_s5 + $0x3f8] sm:$0xff] }
  0x1a   : > { %657 = vmatpush.msrb.mxu3 %v2237_v24  ;;  %v2274_v48 = vld [vmem:[%s4156_s5 + $0x2c0] sm:$0xff]  ;;  %v2272_v51 = vld [vmem:[%s4156_s5 + $0x2b0] sm:$0xff]  ;;  %v2311_v52 = vld [vmem:[%s4156_s5 + $0x3e8] sm:$0xff] }
  0x1b   : > { %535 = vmatpush.msrb.mxu0 %v2215_v17  ;;  %598 = vmatpush.msrb.mxu1 %v473_v26  ;;  %v2270_v54 = vld [vmem:[%s4156_s5 + $0x2a0] sm:$0xff]  ;;  %v2309_v55 = vld [vmem:[%s4156_s5 + $0x3d8] sm:$0xff]  ;;  %v2307_v56 = vld [vmem:[%s4156_s5 + $0x3c8] sm:$0xff] }
  0x1c   : > { %658 = vmatpush.msrb.mxu3 %v2235_v27  ;;  %v688_v57 = vld [vmem:[%s4154_s3] sm:$0x3]  ;;  %v2268_v58 = vld [vmem:[%s4156_s5 + $0x290] sm:$0xff]  ;;  %v2305_v59 = vld [vmem:[%s4156_s5 + $0x3b8] sm:$0xff] }
  0x1d   : > { %536 = vmatpush.msrb.mxu0 %v2213_v18  ;;  %599 = vmatpush.msrb.mxu1 %v471_v29  ;;  %v2266_v61 = vld [vmem:[%s4156_s5 + $0x280] sm:$0xff]  ;;  %v690_v63 = vperm.slane %v688_v57, 0  ;;  %v2303_v0 = vld [vmem:[%s4156_s5 + $0x3a8] sm:$0xff]  ;;  %v2264_v2 = vld [vmem:[%s4156_s5 + $0x270] sm:$0xff]  ;;  %v691_v5 = vperm.slane %v688_v57, 1 }
  0x1e   : > { %659 = vmatpush.msrb.mxu3 %v2233_v30  ;;  %v2301_v6 = vld [vmem:[%s4156_s5 + $0x398] sm:$0xff]  ;;  %v2262_v8 = vld [vmem:[%s4156_s5 + $0x260] sm:$0xff]  ;;  %v2299_v11 = vld [vmem:[%s4156_s5 + $0x388] sm:$0xff] }
  0x1f   : > { %537 = vmatpush.msrb.mxu0 %v2211_v19  ;;  %600 = vmatpush.msrb.mxu1 %v469_v32  ;;  %v2260_v12 = vld [vmem:[%s4156_s5 + $0x250] sm:$0xff]  ;;  %v700_v15 = vld [vmem:[%s4155_s4] sm:$0xf]  ;;  %v2297_v16 = vld [vmem:[%s4156_s5 + $0x378] sm:$0xff] }
  0x20   : > { %660 = vmatpush.msrb.mxu3 %v2231_v33  ;;  %v2281_v18 = vld [vmem:[%s4156_s5 + $0x2f8] sm:$0xff]  ;;  %v2258_v19 = vld [vmem:[%s4156_s5 + $0x240] sm:$0xff]  ;;  %v2295_v23 = vld [vmem:[%s4156_s5 + $0x368] sm:$0xff] }
  0x21   : > { %575 = vmatpush.msra.mxu0 %v478_v20  ;;  %v2312_v20 = vld [vmem:[%s4156_s5 + $0x3f0] sm:$0xff]  ;;  %v2310_v24 = vld [vmem:[%s4156_s5 + $0x3e0] sm:$0xff]  ;;  %v2293_v27 = vld [vmem:[%s4156_s5 + $0x358] sm:$0xff] }
  0x22   : > { %661 = vmatpush.msrb.mxu3 %v2229_v34  ;;  %v2254_v26 = vld [vmem:[%s4156_s5 + $0x220] sm:$0xff]  ;;  %v2308_v29 = vld [vmem:[%s4156_s5 + $0x3d0] sm:$0xff]  ;;  %v2275_v30 = vld [vmem:[%s4156_s5 + $0x2c8] sm:$0xff] }
  0x23   : > { %576 = vmatpush.msra.mxu0 %v476_v21  ;;  %v2279_v21 = vld [vmem:[%s4156_s5 + $0x2e8] sm:$0xff]  ;;  %v2306_v33 = vld [vmem:[%s4156_s5 + $0x3c0] sm:$0xff]  ;;  %v2273_v34 = vld [vmem:[%s4156_s5 + $0x2b8] sm:$0xff] }
  0x24   : > { %v2291_v32 = vld [vmem:[%s4156_s5 + $0x348] sm:$0xff]  ;;  %v2294_v57 = vld [vmem:[%s4156_s5 + $0x360] sm:$0xff] }
  0x25   : > { %577 = vmatpush.msra.mxu0 %v474_v22  ;;  %v2256_v22 = vld [vmem:[%s4156_s5 + $0x230] sm:$0xff] }
  0x27   : > { %578 = vmatpush.msra.mxu0 %v472_v25  ;;  %v2277_v25 = vld [vmem:[%s4156_s5 + $0x2d8] sm:$0xff] }
  0x29   : > { %579 = vmatpush.msra.mxu0 %v470_v28  ;;  %v2247_v28 = vld [vmem:[%s4155_s4 + $0x4] sm:$0xf] }
  0x2b   : > { %580 = vmatpush.msra.mxu0 %v468_v31  ;;  %v2252_v31 = vld [vmem:[%s4156_s5 + $0x210] sm:$0xff] }
  0x8f   : > { %v502_v36 = vpop.f32.mrf.mxu1 }
  0x90   : > { %2223 = vmatmul.msk.f32.vlgmr.msrb.gmra.mxu0 %vm518_vm1, %v502_v36  ;;  %2224 = vmatmul.msk.f32.vlgmr.msra.gmra.mxu3 %vm518_vm1, %v502_v36  ;;  %v2289_v36 = vld [vmem:[%s4156_s5 + $0x338] sm:$0xff] }
  0x91   : > { %v465_v38 = vpop.f32.mrf.mxu0  ;;  %676 = vmatpush.msrb.mxu0 %v2240_v35  ;;  %979 = vmatpush.msra.mxu3 %v2313_v49  ;;  %v2250_v35 = vld [vmem:[%s4156_s5 + $0x200] sm:$0xff] }
  0x92   : > { %2226 = vmatmul.msk.f32.vlgmr.msrb.gmra.mxu1 %vm518_vm1, %v465_v38  ;;  %v2298_v49 = vld [vmem:[%s4156_s5 + $0x380] sm:$0xff] }
  0x93   : > { %677 = vmatpush.msrb.mxu0 %v2238_v37  ;;  %980 = vmatpush.msra.mxu3 %v2311_v52  ;;  %v2304_v37 = vld [vmem:[%s4156_s5 + $0x3b0] sm:$0xff]  ;;  %v808_v52 = vld [vmem:[%s4156_s5 + $0x1f8] sm:$0xff] }
  0x95   : > { %678 = vmatpush.msrb.mxu0 %v2236_v39  ;;  %981 = vmatpush.msra.mxu3 %v2309_v55  ;;  %v775_v39 = vld [vmem:[%s4156_s5 + $0xf0] sm:$0xff] }
  0x96   : > { %v627_v41 = vpop.f32.mrf.mxu2  ;;  %v767_v55 = vld [vmem:[%s4156_s5 + $0xb0] sm:$0xff] }
  0x97   : > { %679 = vmatpush.msrb.mxu0 %v2234_v40  ;;  %982 = vmatpush.msra.mxu3 %v2307_v56  ;;  %v2287_v40 = vld [vmem:[%s4156_s5 + $0x328] sm:$0xff] }
  0x98   : > { %2225 = vmatmul.msk.f32.vlgmr.msra.gmra.mxu0 %vm518_vm1, %v465_v38  ;;  %2241 = vmatmul.msk.f32.vlgmr.msrb.gmra.mxu3 %vm518_vm1, %v627_v41  ;;  %v2271_v38 = vld [vmem:[%s4156_s5 + $0x2a8] sm:$0xff] }
  0x99   : > { %680 = vmatpush.msrb.mxu0 %v2232_v42  ;;  %983 = vmatpush.msra.mxu3 %v2305_v59  ;;  %v2269_v42 = vld [vmem:[%s4156_s5 + $0x298] sm:$0xff]  ;;  %v806_v56 = vld [vmem:[%s4156_s5 + $0x1e8] sm:$0xff]  ;;  %v765_v59 = vld [vmem:[%s4156_s5 + $0xa0] sm:$0xff] }
  0x9b   : > { %681 = vmatpush.msrb.mxu0 %v2230_v43  ;;  %984 = vmatpush.msra.mxu3 %v2303_v0  ;;  %v773_v43 = vld [vmem:[%s4156_s5 + $0xe0] sm:$0xff] }
  0x9c   : > { %v2290_v0 = vld [vmem:[%s4156_s5 + $0x340] sm:$0xff] }
  0x9d   : > { %919 = vmatpush.msra.mxu0 %v2280_v45  ;;  %985 = vmatpush.msra.mxu3 %v2301_v6  ;;  %v2300_v45 = vld [vmem:[%s4156_s5 + $0x390] sm:$0xff]  ;;  %v2286_v6 = vld [vmem:[%s4156_s5 + $0x320] sm:$0xff] }
  0x9f   : > { %920 = vmatpush.msra.mxu0 %v2278_v46  ;;  %986 = vmatpush.msra.mxu3 %v2299_v11  ;;  %v2267_v46 = vld [vmem:[%s4156_s5 + $0x288] sm:$0xff]  ;;  %v776_v11 = vld [vmem:[%s4156_s5 + $0xf8] sm:$0xff] }
  0xa0   : > { %2242 = vmatmul.msk.f32.vlgmr.msrb.gmra.mxu0 %vm518_vm1, %v627_v41  ;;  %v2302_v41 = vld [vmem:[%s4156_s5 + $0x3a0] sm:$0xff] }
  0xa1   : > { %921 = vmatpush.msra.mxu0 %v2276_v47  ;;  %987 = vmatpush.msra.mxu3 %v2297_v16  ;;  %v771_v47 = vld [vmem:[%s4156_s5 + $0xd0] sm:$0xff]  ;;  %v774_v16 = vld [vmem:[%s4156_s5 + $0xe8] sm:$0xff] }
  0xa3   : > { %922 = vmatpush.msra.mxu0 %v2274_v48  ;;  %988 = vmatpush.msra.mxu3 %v2295_v23  ;;  %v2283_v48 = vld [vmem:[%s4156_s5 + $0x308] sm:$0xff]  ;;  %v768_v23 = vld [vmem:[%s4156_s5 + $0xb8] sm:$0xff] }
  0xa5   : > { %923 = vmatpush.msra.mxu0 %v2272_v51  ;;  %989 = vmatpush.msra.mxu3 %v2293_v27  ;;  %v769_v51 = vld [vmem:[%s4156_s5 + $0xc0] sm:$0xff] }
  0xa6   : > { %v753_v27 = vld [vmem:[%s4156_s5 + $0x40] sm:$0xff] }
  0xa7   : > { %924 = vmatpush.msra.mxu0 %v2270_v54  ;;  %990 = vmatpush.msra.mxu3 %v2291_v32  ;;  %v2263_v54 = vld [vmem:[%s4156_s5 + $0x268] sm:$0xff]  ;;  %v791_v32 = vld [vmem:[%s4156_s5 + $0x170] sm:$0xff] }
  0xa9   : > { %925 = vmatpush.msra.mxu0 %v2268_v58  ;;  %991 = vmatpush.msra.mxu3 %v2289_v36  ;;  %v2261_v58 = vld [vmem:[%s4156_s5 + $0x258] sm:$0xff]  ;;  %v789_v36 = vld [vmem:[%s4156_s5 + $0x160] sm:$0xff] }
  0xab   : > { %926 = vmatpush.msra.mxu0 %v2266_v61  ;;  %992 = vmatpush.msra.mxu3 %v2287_v40  ;;  %v2292_v61 = vld [vmem:[%s4156_s5 + $0x350] sm:$0xff] }
  0xac   : > { %v787_v40 = vld [vmem:[%s4156_s5 + $0x150] sm:$0xff] }
  0xad   : > { %927 = vmatpush.msra.mxu0 %v2264_v2  ;;  %v761_v2 = vld [vmem:[%s4156_s5 + $0x80] sm:$0xff] }
  0xaf   : > { %928 = vmatpush.msra.mxu0 %v2262_v8  ;;  %v757_v8 = vld [vmem:[%s4156_s5 + $0x60] sm:$0xff] }
  0xb1   : > { %929 = vmatpush.msra.mxu0 %v2260_v12  ;;  %v755_v12 = vld [vmem:[%s4156_s5 + $0x50] sm:$0xff] }
  0xb3   : > { %930 = vmatpush.msra.mxu0 %v2258_v19  ;;  %v772_v19 = vld [vmem:[%s4156_s5 + $0xd8] sm:$0xff] }
  0xb5   : > { %931 = vmatpush.msra.mxu0 %v2256_v22  ;;  %v801_v22 = vld [vmem:[%s4156_s5 + $0x1c0] sm:$0xff] }
  0xb7   : > { %932 = vmatpush.msra.mxu0 %v2254_v26  ;;  %v795_v26 = vld [vmem:[%s4156_s5 + $0x190] sm:$0xff] }
  0xb9   : > { %933 = vmatpush.msra.mxu0 %v2252_v31  ;;  %v751_v31 = vld [vmem:[%s4156_s5 + $0x30] sm:$0xff] }
  0xbb   : > { %934 = vmatpush.msra.mxu0 %v2250_v35  ;;  %v749_v35 = vld [vmem:[%s4156_s5 + $0x20] sm:$0xff] }
  0xbd   : > { %999 = vmatpush.msrb.mxu0 %v775_v39  ;;  %v747_v39 = vld [vmem:[%s4156_s5 + $0x10] sm:$0xff] }
  0xbf   : > { %1000 = vmatpush.msrb.mxu0 %v773_v43  ;;  %v745_v43 = vld [vmem:[%s4156_s5] sm:$0xff] }
  0xc1   : > { %1001 = vmatpush.msrb.mxu0 %v771_v47  ;;  %v783_v47 = vld [vmem:[%s4156_s5 + $0x130] sm:$0xff] }
  0xc3   : > { %1002 = vmatpush.msrb.mxu0 %v769_v51  ;;  %v754_v51 = vld [vmem:[%s4156_s5 + $0x48] sm:$0xff] }
  0xc5   : > { %1003 = vmatpush.msrb.mxu0 %v767_v55  ;;  %v788_v55 = vld [vmem:[%s4156_s5 + $0x158] sm:$0xff] }
  0xc7   : > { %1004 = vmatpush.msrb.mxu0 %v765_v59  ;;  %v748_v59 = vld [vmem:[%s4156_s5 + $0x18] sm:$0xff] }
 0x10d   : > { %v539_v44 = vpop.f32.mrf.mxu0 }
 0x10f   : > { %v602_v60 = vpop.f32.mrf.mxu1 }
 0x113   : > { %v559_v50 = vpop.f32.mrf.mxu3 }
 0x114   : > { %v603_v3 = vadd.f32 %v602_v60, %v559_v50  ;;  %v2265_v50 = vld [vmem:[%s4156_s5 + $0x278] sm:$0xff] }
 0x115   : > { %v582_v53 = vpop.f32.mrf.mxu0  ;;  %v804_v60 = vld [vmem:[%s4156_s5 + $0x1d8] sm:$0xff] }
 0x116   : > { %v583_v62 = vadd.f32 %v582_v53, %v539_v44  ;;  %v2285_v44 = vld [vmem:[%s4156_s5 + $0x318] sm:$0xff]  ;;  %v2296_v53 = vld [vmem:[%s4156_s5 + $0x370] sm:$0xff] }
 0x117   : > { %993 = vmatpush.msra.mxu3 %v2285_v44  ;;  %v785_v44 = vld [vmem:[%s4156_s5 + $0x140] sm:$0xff] }
 0x119   : > { %994 = vmatpush.msra.mxu3 %v2283_v48  ;;  %v756_v48 = vld [vmem:[%s4156_s5 + $0x58] sm:$0xff] }
 0x11b   : > { %v663_v1 = vpop.f32.mrf.mxu3  ;;  %1059 = vmatpush.msrb.mxu3 %v808_v52  ;;  %v790_v52 = vld [vmem:[%s4156_s5 + $0x168] sm:$0xff] }
 0x11c   : > { %v686_v4 = vadd.f32 %v663_v1, %v583_v62  ;;  %v2259_v62 = vld [vmem:[%s4156_s5 + $0x248] sm:$0xff]  ;;  %v2257_v1 = vld [vmem:[%s4156_s5 + $0x238] sm:$0xff] }
 0x11d   : > { %v683_v7 = vpop.f32.mrf.mxu0  ;;  %1060 = vmatpush.msrb.mxu3 %v806_v56  ;;  %v777_v56 = vld [vmem:[%s4156_s5 + $0x100] sm:$0xff] }
 0x11e   : > { %v694_v9 = vadd.f32 %v690_v63, %v686_v4  ;;  %v687_v10 = vadd.f32 %v683_v7, %v603_v3  ;;  %v763_v63 = vld [vmem:[%s4156_s5 + $0x90] sm:$0xff]  ;;  %v2255_v4 = vld [vmem:[%s4156_s5 + $0x228] sm:$0xff]  ;;  %v2253_v7 = vld [vmem:[%s4156_s5 + $0x218] sm:$0xff] }
 0x11f   : > { %1061 = vmatpush.msrb.mxu3 %v804_v60  ;;  %v2288_v3 = vld [vmem:[%s4156_s5 + $0x330] sm:$0xff]  ;;  %1005 = vmatpush.msrb.mxu0 %v763_v63  ;;  %v784_v60 = vld [vmem:[%s4156_s5 + $0x138] sm:$0xff] }
 0x120   : > { %v2854_v13 = vclamps-f32 %v694_v9, 1.0  ;;  %v695_v14 = vadd.f32 %v691_v5, %v687_v10  ;;  %v759_v5 = vld [vmem:[%s4156_s5 + $0x70] sm:$0xff]  ;;  %v2251_v10 = vld [vmem:[%s4156_s5 + $0x208] sm:$0xff]  ;;  %v780_v63 = vld [vmem:[%s4156_s5 + $0x118] sm:$0xff] }
 0x121   : > { %1006 = vmatpush.msrb.mxu0 %v761_v2  ;;  %v2284_v9 = vld [vmem:[%s4156_s5 + $0x310] sm:$0xff] }
 0x122   : > { %v2862_v17 = vclamps-f32 %v695_v14, 1.0  ;;  %720 = vmatpush.msra.mxu1 %v2854_v13  ;;  %v2282_v14 = vld [vmem:[%s4156_s5 + $0x300] sm:$0xff] }
 0x123   : > { %2245 = vmatmul.msk.f32.vlgmr.msra.gmra.mxu1 %vm701_vm2, %v700_v15  ;;  %1007 = vmatpush.msrb.mxu0 %v759_v5  ;;  %v2379_v5 = vld [vmem:[%s4156_s5 + $0x5f0] sm:$0xff] }
 0x124   : > { %829 = vmatpush.msrb.mxu1 %v2854_v13  ;;  %740 = vmatpush.msrb.mxu2 %v2862_v17 }
 0x125   : > { %2246 = vmatmul.msk.f32.vlgmr.msrb.gmra.mxu2 %vm701_vm2, %v700_v15  ;;  %1008 = vmatpush.msrb.mxu0 %v757_v8  ;;  %v807_v15 = vld [vmem:[%s4156_s5 + $0x1f0] sm:$0xff] }
 0x126   : > { %959 = vmatpush.msra.mxu1 %v2281_v18  ;;  %849 = vmatpush.msra.mxu2 %v2862_v17  ;;  %v805_v18 = vld [vmem:[%s4156_s5 + $0x1e0] sm:$0xff]  ;;  %v2375_v8 = vld [vmem:[%s4156_s5 + $0x5d0] sm:$0xff] }
 0x127   : > { %1009 = vmatpush.msrb.mxu0 %v755_v12  ;;  %v2348_v12 = vld [vmem:[%s4156_s5 + $0x4f8] sm:$0xff] }
 0x128   : > { %939 = vmatpush.msrb.mxu2 %v2312_v20  ;;  %960 = vmatpush.msra.mxu1 %v2279_v21  ;;  %v803_v20 = vld [vmem:[%s4156_s5 + $0x1d0] sm:$0xff]  ;;  %v770_v21 = vld [vmem:[%s4156_s5 + $0xc8] sm:$0xff] }
 0x129   : > { %1010 = vmatpush.msrb.mxu0 %v753_v27  ;;  %v2368_v27 = vld [vmem:[%s4156_s5 + $0x598] sm:$0xff] }
 0x12a   : > { %940 = vmatpush.msrb.mxu2 %v2310_v24  ;;  %961 = vmatpush.msra.mxu1 %v2277_v25  ;;  %v799_v24 = vld [vmem:[%s4156_s5 + $0x1b0] sm:$0xff]  ;;  %v797_v25 = vld [vmem:[%s4156_s5 + $0x1a0] sm:$0xff] }
 0x12b   : > { %2248 = vmatmul.msk.f32.vlgmr.msrb.gmra.mxu1 %vm701_vm2, %v2247_v28  ;;  %1011 = vmatpush.msrb.mxu0 %v751_v31  ;;  %v2366_v31 = vld [vmem:[%s4156_s5 + $0x588] sm:$0xff] }
 0x12c   : > { %941 = vmatpush.msrb.mxu2 %v2308_v29  ;;  %962 = vmatpush.msra.mxu1 %v2275_v30  ;;  %v766_v29 = vld [vmem:[%s4156_s5 + $0xa8] sm:$0xff] }
 0x12d   : > { %2249 = vmatmul.msk.f32.vlgmr.msra.gmra.mxu2 %vm701_vm2, %v2247_v28  ;;  %v793_v28 = vld [vmem:[%s4156_s5 + $0x180] sm:$0xff]  ;;  %v802_v30 = vld [vmem:[%s4156_s5 + $0x1c8] sm:$0xff]  ;;  %1012 = vmatpush.msrb.mxu0 %v749_v35  ;;  %v2364_v35 = vld [vmem:[%s4156_s5 + $0x578] sm:$0xff] }
 0x12e   : > { %942 = vmatpush.msrb.mxu2 %v2306_v33  ;;  %963 = vmatpush.msra.mxu1 %v2273_v34  ;;  %v764_v33 = vld [vmem:[%s4156_s5 + $0x98] sm:$0xff] }
 0x12f   : > { %1062 = vmatpush.msrb.mxu3 %v802_v30  ;;  %v800_v34 = vld [vmem:[%s4156_s5 + $0x1b8] sm:$0xff]  ;;  %1013 = vmatpush.msrb.mxu0 %v747_v39  ;;  %v2362_v39 = vld [vmem:[%s4156_s5 + $0x568] sm:$0xff] }
 0x130   : > { %943 = vmatpush.msrb.mxu2 %v2304_v37  ;;  %964 = vmatpush.msra.mxu1 %v2271_v38  ;;  %v762_v37 = vld [vmem:[%s4156_s5 + $0x88] sm:$0xff]  ;;  %v2340_v30 = vld [vmem:[%s4156_s5 + $0x4b8] sm:$0xff] }
 0x131   : > { %v798_v38 = vld [vmem:[%s4156_s5 + $0x1a8] sm:$0xff]  ;;  %1063 = vmatpush.msrb.mxu3 %v800_v34  ;;  %1014 = vmatpush.msrb.mxu0 %v745_v43  ;;  %v2360_v43 = vld [vmem:[%s4156_s5 + $0x558] sm:$0xff] }
 0x132   : > { %944 = vmatpush.msrb.mxu2 %v2302_v41  ;;  %965 = vmatpush.msra.mxu1 %v2269_v42  ;;  %v760_v41 = vld [vmem:[%s4156_s5 + $0x78] sm:$0xff]  ;;  %v2338_v34 = vld [vmem:[%s4156_s5 + $0x4a8] sm:$0xff] }
 0x133   : > { %v796_v42 = vld [vmem:[%s4156_s5 + $0x198] sm:$0xff]  ;;  %1064 = vmatpush.msrb.mxu3 %v798_v38 }
 0x134   : > { %945 = vmatpush.msrb.mxu2 %v2300_v45  ;;  %966 = vmatpush.msra.mxu1 %v2267_v46  ;;  %v758_v45 = vld [vmem:[%s4156_s5 + $0x68] sm:$0xff]  ;;  %v2336_v38 = vld [vmem:[%s4156_s5 + $0x498] sm:$0xff] }
 0x135   : > { %1065 = vmatpush.msrb.mxu3 %v796_v42  ;;  %v794_v46 = vld [vmem:[%s4156_s5 + $0x188] sm:$0xff] }
 0x136   : > { %946 = vmatpush.msrb.mxu2 %v2298_v49  ;;  %967 = vmatpush.msra.mxu1 %v2265_v50  ;;  %v792_v49 = vld [vmem:[%s4156_s5 + $0x178] sm:$0xff]  ;;  %v781_v50 = vld [vmem:[%s4156_s5 + $0x120] sm:$0xff]  ;;  %v2334_v42 = vld [vmem:[%s4156_s5 + $0x488] sm:$0xff] }
 0x137   : > { %1066 = vmatpush.msrb.mxu3 %v794_v46  ;;  %v2332_v46 = vld [vmem:[%s4156_s5 + $0x478] sm:$0xff] }
 0x138   : > { %947 = vmatpush.msrb.mxu2 %v2296_v53  ;;  %968 = vmatpush.msra.mxu1 %v2263_v54  ;;  %v779_v53 = vld [vmem:[%s4156_s5 + $0x110] sm:$0xff]  ;;  %v752_v54 = vld [vmem:[%s4156_s5 + $0x38] sm:$0xff] }
 0x139   : > { %1067 = vmatpush.msrb.mxu3 %v792_v49  ;;  %v2355_v49 = vld [vmem:[%s4156_s5 + $0x530] sm:$0xff] }
 0x13a   : > { %948 = vmatpush.msrb.mxu2 %v2294_v57  ;;  %969 = vmatpush.msra.mxu1 %v2261_v58  ;;  %v750_v57 = vld [vmem:[%s4156_s5 + $0x28] sm:$0xff] }
 0x13b   : > { %1068 = vmatpush.msrb.mxu3 %v790_v52  ;;  %v786_v58 = vld [vmem:[%s4156_s5 + $0x148] sm:$0xff]  ;;  %v2327_v52 = vld [vmem:[%s4156_s5 + $0x450] sm:$0xff] }
 0x13c   : > { %949 = vmatpush.msrb.mxu2 %v2292_v61  ;;  %970 = vmatpush.msra.mxu1 %v2259_v62  ;;  %v746_v61 = vld [vmem:[%s4156_s5 + $0x8] sm:$0xff] }
 0x13d   : > { %1069 = vmatpush.msrb.mxu3 %v788_v55  ;;  %v782_v62 = vld [vmem:[%s4156_s5 + $0x128] sm:$0xff] }
 0x13e   : > { %950 = vmatpush.msrb.mxu2 %v2290_v0  ;;  %971 = vmatpush.msra.mxu1 %v2257_v1  ;;  %v778_v0 = vld [vmem:[%s4156_s5 + $0x108] sm:$0xff] }
 0x13f   : > { %1070 = vmatpush.msrb.mxu3 %v786_v58  ;;  %v2354_v55 = vld [vmem:[%s4156_s5 + $0x528] sm:$0xff] }
 0x140   : > { %951 = vmatpush.msrb.mxu2 %v2288_v3  ;;  %972 = vmatpush.msra.mxu1 %v2255_v4  ;;  %v2326_v58 = vld [vmem:[%s4156_s5 + $0x448] sm:$0xff] }
 0x141   : > { %1071 = vmatpush.msrb.mxu3 %v784_v60  ;;  %v2323_v60 = vld [vmem:[%s4156_s5 + $0x430] sm:$0xff] }
 0x142   : > { %952 = vmatpush.msrb.mxu2 %v2286_v6  ;;  %973 = vmatpush.msra.mxu1 %v2253_v7  ;;  %v2377_v6 = vld [vmem:[%s4156_s5 + $0x5e0] sm:$0xff]  ;;  %v2314_v7 = vld [vmem:[%s4155_s4 + $0x8] sm:$0xf] }
 0x143   : > { %1072 = vmatpush.msrb.mxu3 %v782_v62  ;;  %v2324_v62 = vld [vmem:[%s4156_s5 + $0x438] sm:$0xff] }
 0x144   : > { %953 = vmatpush.msrb.mxu2 %v2284_v9  ;;  %974 = vmatpush.msra.mxu1 %v2251_v10  ;;  %v2376_v9 = vld [vmem:[%s4156_s5 + $0x5d8] sm:$0xff]  ;;  %v2347_v10 = vld [vmem:[%s4156_s5 + $0x4f0] sm:$0xff] }
 0x145   : > { %1073 = vmatpush.msrb.mxu3 %v780_v63  ;;  %v2350_v63 = vld [vmem:[%s4156_s5 + $0x508] sm:$0xff] }
 0x146   : > { %1039 = vmatpush.msrb.mxu1 %v776_v11  ;;  %954 = vmatpush.msrb.mxu2 %v2282_v14  ;;  %v2373_v11 = vld [vmem:[%s4156_s5 + $0x5c0] sm:$0xff]  ;;  %v2374_v14 = vld [vmem:[%s4156_s5 + $0x5c8] sm:$0xff] }
 0x147   : > { %1074 = vmatpush.msrb.mxu3 %v778_v0  ;;  %v2321_v0 = vld [vmem:[%s4156_s5 + $0x420] sm:$0xff] }
 0x148   : > { %1019 = vmatpush.msra.mxu2 %v807_v15  ;;  %1040 = vmatpush.msrb.mxu1 %v774_v16  ;;  %v2345_v15 = vld [vmem:[%s4156_s5 + $0x4e0] sm:$0xff]  ;;  %v2371_v16 = vld [vmem:[%s4156_s5 + $0x5b0] sm:$0xff] }
 0x14a   : > { %1020 = vmatpush.msra.mxu2 %v805_v18  ;;  %1041 = vmatpush.msrb.mxu1 %v772_v19  ;;  %v2346_v18 = vld [vmem:[%s4156_s5 + $0x4e8] sm:$0xff]  ;;  %v2372_v19 = vld [vmem:[%s4156_s5 + $0x5b8] sm:$0xff] }
 0x14c   : > { %1021 = vmatpush.msra.mxu2 %v803_v20  ;;  %1042 = vmatpush.msrb.mxu1 %v770_v21  ;;  %v2343_v20 = vld [vmem:[%s4156_s5 + $0x4d0] sm:$0xff]  ;;  %v2369_v21 = vld [vmem:[%s4156_s5 + $0x5a0] sm:$0xff] }
 0x14e   : > { %1022 = vmatpush.msra.mxu2 %v801_v22  ;;  %1043 = vmatpush.msrb.mxu1 %v768_v23  ;;  %v2344_v22 = vld [vmem:[%s4156_s5 + $0x4d8] sm:$0xff]  ;;  %v2370_v23 = vld [vmem:[%s4156_s5 + $0x5a8] sm:$0xff] }
 0x150   : > { %1023 = vmatpush.msra.mxu2 %v799_v24  ;;  %1044 = vmatpush.msrb.mxu1 %v766_v29  ;;  %v2341_v24 = vld [vmem:[%s4156_s5 + $0x4c0] sm:$0xff] }
 0x151   : > { %v2365_v29 = vld [vmem:[%s4156_s5 + $0x580] sm:$0xff] }
 0x152   : > { %1024 = vmatpush.msra.mxu2 %v797_v25  ;;  %1045 = vmatpush.msrb.mxu1 %v764_v33  ;;  %v2367_v25 = vld [vmem:[%s4156_s5 + $0x590] sm:$0xff] }
 0x153   : > { %v2363_v33 = vld [vmem:[%s4156_s5 + $0x570] sm:$0xff] }
 0x154   : > { %1025 = vmatpush.msra.mxu2 %v795_v26  ;;  %1046 = vmatpush.msrb.mxu1 %v762_v37  ;;  %v2342_v26 = vld [vmem:[%s4156_s5 + $0x4c8] sm:$0xff]  ;;  %v2361_v37 = vld [vmem:[%s4156_s5 + $0x560] sm:$0xff] }
 0x156   : > { %1026 = vmatpush.msra.mxu2 %v793_v28  ;;  %1047 = vmatpush.msrb.mxu1 %v760_v41  ;;  %v2339_v28 = vld [vmem:[%s4156_s5 + $0x4b0] sm:$0xff] }
 0x157   : > { %v2359_v41 = vld [vmem:[%s4156_s5 + $0x550] sm:$0xff] }
 0x158   : > { %1027 = vmatpush.msra.mxu2 %v791_v32  ;;  %1048 = vmatpush.msrb.mxu1 %v758_v45  ;;  %v2337_v32 = vld [vmem:[%s4156_s5 + $0x4a0] sm:$0xff] }
 0x159   : > { %v2357_v45 = vld [vmem:[%s4156_s5 + $0x540] sm:$0xff] }
 0x15a   : > { %1028 = vmatpush.msra.mxu2 %v789_v36  ;;  %1049 = vmatpush.msrb.mxu1 %v756_v48  ;;  %v2335_v36 = vld [vmem:[%s4156_s5 + $0x490] sm:$0xff]  ;;  %v2329_v48 = vld [vmem:[%s4156_s5 + $0x460] sm:$0xff] }
 0x15c   : > { %1029 = vmatpush.msra.mxu2 %v787_v40  ;;  %1050 = vmatpush.msrb.mxu1 %v754_v51  ;;  %v2333_v40 = vld [vmem:[%s4156_s5 + $0x480] sm:$0xff]  ;;  %v2356_v51 = vld [vmem:[%s4156_s5 + $0x538] sm:$0xff] }
 0x15e   : > { %1030 = vmatpush.msra.mxu2 %v785_v44  ;;  %1051 = vmatpush.msrb.mxu1 %v752_v54  ;;  %v2331_v44 = vld [vmem:[%s4156_s5 + $0x470] sm:$0xff]  ;;  %v2328_v54 = vld [vmem:[%s4156_s5 + $0x458] sm:$0xff] }
 0x160   : > { %1031 = vmatpush.msra.mxu2 %v783_v47  ;;  %1052 = vmatpush.msrb.mxu1 %v750_v57  ;;  %v2358_v47 = vld [vmem:[%s4156_s5 + $0x548] sm:$0xff]  ;;  %v2351_v57 = vld [vmem:[%s4156_s5 + $0x510] sm:$0xff] }
 0x162   : > { %1032 = vmatpush.msra.mxu2 %v781_v50  ;;  %1053 = vmatpush.msrb.mxu1 %v748_v59  ;;  %v2330_v50 = vld [vmem:[%s4156_s5 + $0x468] sm:$0xff]  ;;  %v2352_v59 = vld [vmem:[%s4156_s5 + $0x518] sm:$0xff] }
 0x164   : > { %1033 = vmatpush.msra.mxu2 %v779_v53  ;;  %1054 = vmatpush.msrb.mxu1 %v746_v61  ;;  %v2353_v53 = vld [vmem:[%s4156_s5 + $0x520] sm:$0xff] }
 0x165   : > { %v2349_v61 = vld [vmem:[%s4156_s5 + $0x500] sm:$0xff] }
 0x166   : > { %1034 = vmatpush.msra.mxu2 %v777_v56  ;;  %v2325_v56 = vld [vmem:[%s4156_s5 + $0x440] sm:$0xff] }
 0x1a0   : > { %v722_v1 = vpop.f32.mrf.mxu1 }
 0x1a8   : > { %v742_v2 = vpop.f32.mrf.mxu2  ;;  %v831_v3 = vpop.f32.mrf.mxu1 }
 0x1a9   : > { %935 = vmatmul.f32.vlgmr.msra.gmra.mxu0 %v831_v3  ;;  %975 = vmatmul.f32.vlgmr.msra.gmra.mxu1 %v831_v3  ;;  %v2319_v3 = vld [vmem:[%s4156_s5 + $0x410] sm:$0xff] }
 0x1aa   : > { %1099 = vmatpush.msra.mxu0 %v2854_v13  ;;  %v2380_v13 = vld [vmem:[%s4156_s5 + $0x5f8] sm:$0xff]  ;;  %1189 = vmatpush.msra.mxu1 %v2347_v10  ;;  %v1311_v10 = vld [vmem:[%s4159_s8 + $0xe0] sm:$0xff] }
 0x1ac   : > { %1190 = vmatpush.msra.mxu1 %v2345_v15  ;;  %v1310_v15 = vld [vmem:[%s4159_s8 + $0xd8] sm:$0xff] }
 0x1ae   : > { %1191 = vmatpush.msra.mxu1 %v2343_v20  ;;  %v1322_v20 = vld [vmem:[%s4159_s8 + $0x138] sm:$0xff] }
 0x1b0   : > { %v851_v4 = vpop.f32.mrf.mxu2  ;;  %1192 = vmatpush.msra.mxu1 %v2341_v24  ;;  %v1303_v24 = vld [vmem:[%s4159_s8 + $0xa0] sm:$0xff] }
 0x1b1   : > { %955 = vmatmul.f32.vlgmr.msrb.gmra.mxu2 %v851_v4  ;;  %995 = vmatmul.f32.vlgmr.msra.gmra.mxu3 %v851_v4  ;;  %v2320_v4 = vld [vmem:[%s4156_s5 + $0x418] sm:$0xff] }
 0x1b2   : > { %1119 = vmatpush.msrb.mxu2 %v2862_v17  ;;  %1015 = vmatmul.f32.vlgmr.msrb.gmra.mxu0 %v722_v1  ;;  %v2378_v17 = vld [vmem:[%s4156_s5 + $0x5e8] sm:$0xff] }
 0x1b3   : > { %1055 = vmatmul.f32.vlgmr.msrb.gmra.mxu1 %v722_v1  ;;  %1209 = vmatpush.msra.mxu3 %v2379_v5  ;;  %v2322_v1 = vld [vmem:[%s4156_s5 + $0x428] sm:$0xff]  ;;  %v2317_v5 = vld [vmem:[%s4156_s5 + $0x400] sm:$0xff] }
 0x1b4   : > { %1229 = vmatpush.msrb.mxu0 %v2348_v12  ;;  %1193 = vmatpush.msra.mxu1 %v2339_v28  ;;  %v1315_v12 = vld [vmem:[%s4159_s8 + $0x100] sm:$0xff] }
 0x1b5   : > { %1210 = vmatpush.msra.mxu3 %v2377_v6  ;;  %v1321_v6 = vld [vmem:[%s4159_s8 + $0x130] sm:$0xff] }
 0x1b6   : > { %1230 = vmatpush.msrb.mxu0 %v2346_v18  ;;  %1194 = vmatpush.msra.mxu1 %v2337_v32  ;;  %v1307_v18 = vld [vmem:[%s4159_s8 + $0xc0] sm:$0xff] }
 0x1b7   : > { %1211 = vmatpush.msra.mxu3 %v2375_v8  ;;  %v1314_v8 = vld [vmem:[%s4159_s8 + $0xf8] sm:$0xff] }
 0x1b8   : > { %1231 = vmatpush.msrb.mxu0 %v2344_v22  ;;  %1195 = vmatpush.msra.mxu1 %v2335_v36  ;;  %v1320_v22 = vld [vmem:[%s4159_s8 + $0x128] sm:$0xff]  ;;  %v1298_v36 = vld [vmem:[%s4159_s8 + $0x78] sm:$0xff] }
 0x1b9   : > { %1035 = vmatmul.f32.vlgmr.msra.gmra.mxu2 %v742_v2  ;;  %1075 = vmatmul.f32.vlgmr.msrb.gmra.mxu3 %v742_v2 }
 0x1ba   : > { %2315 = vmatmul.msk.f32.vlgmr.msra.gmra.mxu0 %vm701_vm2, %v2314_v7  ;;  %1249 = vmatpush.msra.mxu2 %v2380_v13  ;;  %v2318_v13 = vld [vmem:[%s4156_s5 + $0x408] sm:$0xff] }
 0x1bb   : > { %1212 = vmatpush.msra.mxu3 %v2373_v11  ;;  %1232 = vmatpush.msrb.mxu0 %v2342_v26  ;;  %v1312_v11 = vld [vmem:[%s4159_s8 + $0xe8] sm:$0xff] }
 0x1bc   : > { %1250 = vmatpush.msra.mxu2 %v2378_v17  ;;  %1196 = vmatpush.msra.mxu1 %v2333_v40  ;;  %v1319_v17 = vld [vmem:[%s4159_s8 + $0x120] sm:$0xff] }
 0x1bd   : > { %1213 = vmatpush.msra.mxu3 %v2371_v16  ;;  %1233 = vmatpush.msrb.mxu0 %v2340_v30  ;;  %v1302_v30 = vld [vmem:[%s4159_s8 + $0x98] sm:$0xff] }
 0x1be   : > { %1251 = vmatpush.msra.mxu2 %v2376_v9  ;;  %1197 = vmatpush.msra.mxu1 %v2331_v44  ;;  %v1317_v9 = vld [vmem:[%s4159_s8 + $0x110] sm:$0xff] }
 0x1bf   : > { %1214 = vmatpush.msra.mxu3 %v2369_v21  ;;  %1234 = vmatpush.msrb.mxu0 %v2338_v34  ;;  %v1305_v21 = vld [vmem:[%s4159_s8 + $0xb0] sm:$0xff]  ;;  %v1300_v34 = vld [vmem:[%s4159_s8 + $0x88] sm:$0xff] }
 0x1c0   : > { %1252 = vmatpush.msra.mxu2 %v2374_v14  ;;  %1198 = vmatpush.msra.mxu1 %v2329_v48  ;;  %v1309_v14 = vld [vmem:[%s4159_s8 + $0xd0] sm:$0xff] }
 0x1c1   : > { %2316 = vmatmul.msk.f32.vlgmr.msrb.gmra.mxu2 %vm701_vm2, %v2314_v7  ;;  %1215 = vmatpush.msra.mxu3 %v2367_v25  ;;  %v1313_v7 = vld [vmem:[%s4159_s8 + $0xf0] sm:$0xff]  ;;  %v1318_v25 = vld [vmem:[%s4159_s8 + $0x118] sm:$0xff] }
 0x1c2   : > { %1253 = vmatpush.msra.mxu2 %v2372_v19  ;;  %1235 = vmatpush.msrb.mxu0 %v2336_v38  ;;  %v1308_v19 = vld [vmem:[%s4159_s8 + $0xc8] sm:$0xff]  ;;  %v1295_v38 = vld [vmem:[%s4159_s8 + $0x60] sm:$0xff]  ;;  %v2407_v48 = vld [vmem:[%s4159_s8 + $0x1f0] sm:$0xff] }
 0x1c3   : > { %1216 = vmatpush.msra.mxu3 %v2365_v29  ;;  %1199 = vmatpush.msra.mxu1 %v2327_v52  ;;  %v1301_v29 = vld [vmem:[%s4159_s8 + $0x90] sm:$0xff]  ;;  %v1292_v52 = vld [vmem:[%s4159_s8 + $0x48] sm:$0xff] }
 0x1c4   : > { %1254 = vmatpush.msra.mxu2 %v2370_v23  ;;  %1236 = vmatpush.msrb.mxu0 %v2334_v42  ;;  %v1306_v23 = vld [vmem:[%s4159_s8 + $0xb8] sm:$0xff] }
 0x1c5   : > { %1217 = vmatpush.msra.mxu3 %v2363_v33  ;;  %1200 = vmatpush.msra.mxu1 %v2325_v56  ;;  %v1299_v33 = vld [vmem:[%s4159_s8 + $0x80] sm:$0xff]  ;;  %v1294_v42 = vld [vmem:[%s4159_s8 + $0x58] sm:$0xff] }
 0x1c6   : > { %1255 = vmatpush.msra.mxu2 %v2368_v27  ;;  %1237 = vmatpush.msrb.mxu0 %v2332_v46  ;;  %v1304_v27 = vld [vmem:[%s4159_s8 + $0xa8] sm:$0xff]  ;;  %v2411_v46 = vld [vmem:[%s4159_s8 + $0x210] sm:$0xff]  ;;  %v1290_v56 = vld [vmem:[%s4159_s8 + $0x38] sm:$0xff] }
 0x1c7   : > { %1218 = vmatpush.msra.mxu3 %v2361_v37  ;;  %1201 = vmatpush.msra.mxu1 %v2323_v60  ;;  %v1288_v60 = vld [vmem:[%s4159_s8 + $0x28] sm:$0xff] }
 0x1c8   : > { %1256 = vmatpush.msra.mxu2 %v2366_v31  ;;  %1238 = vmatpush.msrb.mxu0 %v2330_v50  ;;  %v2403_v50 = vld [vmem:[%s4159_s8 + $0x1d0] sm:$0xff] }
 0x1c9   : > { %1219 = vmatpush.msra.mxu3 %v2359_v41  ;;  %1202 = vmatpush.msra.mxu1 %v2321_v0  ;;  %v1293_v41 = vld [vmem:[%s4159_s8 + $0x50] sm:$0xff]  ;;  %v1286_v0 = vld [vmem:[%s4159_s8 + $0x18] sm:$0xff] }
 0x1ca   : > { %1257 = vmatpush.msra.mxu2 %v2364_v35  ;;  %1239 = vmatpush.msrb.mxu0 %v2328_v54  ;;  %v1297_v35 = vld [vmem:[%s4159_s8 + $0x70] sm:$0xff]  ;;  %v1316_v54 = vld [vmem:[%s4159_s8 + $0x108] sm:$0xff] }
 0x1cb   : > { %1220 = vmatpush.msra.mxu3 %v2357_v45  ;;  %1203 = vmatpush.msra.mxu1 %v2319_v3  ;;  %v2413_v45 = vld [vmem:[%s4159_s8 + $0x220] sm:$0xff] }
 0x1cc   : > { %1258 = vmatpush.msra.mxu2 %v2362_v39  ;;  %1240 = vmatpush.msrb.mxu0 %v2326_v58  ;;  %v1296_v39 = vld [vmem:[%s4159_s8 + $0x68] sm:$0xff]  ;;  %v2423_v58 = vld [vmem:[%s4159_s8 + $0x270] sm:$0xff]  ;;  %v1283_v3 = vld [vmem:[%s4159_s8] sm:$0xff] }
 0x1cd   : > { %1221 = vmatpush.msra.mxu3 %v2355_v49  ;;  %1204 = vmatpush.msra.mxu1 %v2317_v5  ;;  %v2405_v49 = vld [vmem:[%s4159_s8 + $0x1e0] sm:$0xff] }
 0x1ce   : > { %1259 = vmatpush.msra.mxu2 %v2360_v43  ;;  %1241 = vmatpush.msrb.mxu0 %v2324_v62  ;;  %v2415_v43 = vld [vmem:[%s4159_s8 + $0x230] sm:$0xff]  ;;  %v2421_v62 = vld [vmem:[%s4159_s8 + $0x260] sm:$0xff] }
 0x1cf   : > { %1222 = vmatpush.msra.mxu3 %v2353_v53  ;;  %1327 = vmatpush.msrb.mxu1 %v1313_v7  ;;  %v2401_v53 = vld [vmem:[%s4159_s8 + $0x1c0] sm:$0xff]  ;;  %v2424_v7 = vld [vmem:[%s4159_s8 + $0x278] sm:$0xff] }
 0x1d0   : > { %1260 = vmatpush.msra.mxu2 %v2358_v47  ;;  %1242 = vmatpush.msrb.mxu0 %v2322_v1  ;;  %v2409_v47 = vld [vmem:[%s4159_s8 + $0x200] sm:$0xff]  ;;  %v2395_v1 = vld [vmem:[%s4159_s8 + $0x190] sm:$0xff] }
 0x1d1   : > { %1223 = vmatpush.msra.mxu3 %v2351_v57  ;;  %1328 = vmatpush.msrb.mxu1 %v1311_v10  ;;  %v2399_v57 = vld [vmem:[%s4159_s8 + $0x1b0] sm:$0xff]  ;;  %v2393_v5 = vld [vmem:[%s4159_s8 + $0x180] sm:$0xff] }
 0x1d2   : > { %1261 = vmatpush.msra.mxu2 %v2356_v51  ;;  %1243 = vmatpush.msrb.mxu0 %v2320_v4  ;;  %v1291_v51 = vld [vmem:[%s4159_s8 + $0x40] sm:$0xff]  ;;  %v1284_v4 = vld [vmem:[%s4159_s8 + $0x8] sm:$0xff] }
 0x1d3   : > { %1224 = vmatpush.msra.mxu3 %v2349_v61  ;;  %1329 = vmatpush.msrb.mxu1 %v1309_v14  ;;  %v2397_v61 = vld [vmem:[%s4159_s8 + $0x1a0] sm:$0xff] }
 0x1d4   : > { %1262 = vmatpush.msra.mxu2 %v2354_v55  ;;  %1244 = vmatpush.msrb.mxu0 %v2318_v13  ;;  %v1289_v55 = vld [vmem:[%s4159_s8 + $0x30] sm:$0xff]  ;;  %v2385_v14 = vld [vmem:[%s4159_s8 + $0x140] sm:$0xff] }
 0x1d5   : > { %1359 = vmatpush.msrb.mxu3 %v1321_v6  ;;  %1330 = vmatpush.msrb.mxu1 %v1307_v18  ;;  %v2417_v6 = vld [vmem:[%s4159_s8 + $0x240] sm:$0xff]  ;;  %v2391_v13 = vld [vmem:[%s4159_s8 + $0x170] sm:$0xff] }
 0x1d6   : > { %1263 = vmatpush.msra.mxu2 %v2352_v59  ;;  %1367 = vmatpush.msra.mxu0 %v1314_v8  ;;  %v1287_v59 = vld [vmem:[%s4159_s8 + $0x20] sm:$0xff] }
 0x1d7   : > { %1360 = vmatpush.msrb.mxu3 %v1319_v17  ;;  %1331 = vmatpush.msrb.mxu1 %v1305_v21  ;;  %v2389_v8 = vld [vmem:[%s4159_s8 + $0x160] sm:$0xff] }
 0x1d8   : > { %1264 = vmatpush.msra.mxu2 %v2350_v63  ;;  %1368 = vmatpush.msra.mxu0 %v1312_v11  ;;  %v1285_v63 = vld [vmem:[%s4159_s8 + $0x10] sm:$0xff] }
 0x1d9   : > { %1361 = vmatpush.msrb.mxu3 %v1317_v9  ;;  %1332 = vmatpush.msrb.mxu1 %v1303_v24  ;;  %v2422_v9 = vld [vmem:[%s4159_s8 + $0x268] sm:$0xff]  ;;  %v2387_v11 = vld [vmem:[%s4159_s8 + $0x150] sm:$0xff] }
 0x1da   : > { %1369 = vmatpush.msra.mxu0 %v1310_v15  ;;  %1399 = vmatpush.msrb.mxu2 %v1322_v20  ;;  %v2418_v15 = vld [vmem:[%s4159_s8 + $0x248] sm:$0xff] }
 0x1db   : > { %1362 = vmatpush.msrb.mxu3 %v1315_v12  ;;  %1333 = vmatpush.msrb.mxu1 %v1301_v29  ;;  %v2420_v12 = vld [vmem:[%s4159_s8 + $0x258] sm:$0xff] }
 0x1dc   : > { %1370 = vmatpush.msra.mxu0 %v1308_v19  ;;  %1400 = vmatpush.msrb.mxu2 %v1320_v22  ;;  %v1271_v22 = vld [vmem:[%s4157_s6] sm:$0x3] }
 0x1dd   : > { %1334 = vmatpush.msrb.mxu1 %v1299_v33 }
 0x1de   : > { %1371 = vmatpush.msra.mxu0 %v1306_v23  ;;  %1401 = vmatpush.msrb.mxu2 %v1318_v25 }
 0x1df   : > { %1335 = vmatpush.msrb.mxu1 %v1297_v35 }
 0x1e0   : > { %1372 = vmatpush.msra.mxu0 %v1304_v27  ;;  %1402 = vmatpush.msrb.mxu2 %v1316_v54  ;;  %v2473_v54 = vld [vmem:[%s4159_s8 + $0x3a8] sm:$0xff] }
 0x1e1   : > { %1336 = vmatpush.msrb.mxu1 %v1295_v38  ;;  %v2414_v38 = vld [vmem:[%s4159_s8 + $0x228] sm:$0xff] }
 0x1e2   : > { %1373 = vmatpush.msra.mxu0 %v1302_v30  ;;  %v1274_v30 = vperm.slane %v1271_v22, 1 }
 0x1e3   : > { %1337 = vmatpush.msrb.mxu1 %v1293_v41  ;;  %v2408_v41 = vld [vmem:[%s4159_s8 + $0x1f8] sm:$0xff] }
 0x1e4   : > { %1374 = vmatpush.msra.mxu0 %v1300_v34 }
 0x1e5   : > { %1338 = vmatpush.msrb.mxu1 %v1291_v51  ;;  %v2388_v51 = vld [vmem:[%s4159_s8 + $0x158] sm:$0xff] }
 0x1e6   : > { %1375 = vmatpush.msra.mxu0 %v1298_v36 }
 0x1e7   : > { %1339 = vmatpush.msrb.mxu1 %v1289_v55  ;;  %v2471_v55 = vld [vmem:[%s4159_s8 + $0x398] sm:$0xff] }
 0x1e8   : > { %1376 = vmatpush.msra.mxu0 %v1296_v39  ;;  %v2412_v39 = vld [vmem:[%s4159_s8 + $0x218] sm:$0xff] }
 0x1e9   : > { %1340 = vmatpush.msrb.mxu1 %v1287_v59 }
 0x1ea   : > { %1377 = vmatpush.msra.mxu0 %v1294_v42  ;;  %v2406_v42 = vld [vmem:[%s4159_s8 + $0x1e8] sm:$0xff] }
 0x1eb   : > { %1341 = vmatpush.msrb.mxu1 %v1285_v63  ;;  %v2472_v63 = vld [vmem:[%s4159_s8 + $0x3a0] sm:$0xff] }
 0x1ec   : > { %1378 = vmatpush.msra.mxu0 %v1292_v52  ;;  %v2386_v52 = vld [vmem:[%s4159_s8 + $0x148] sm:$0xff] }
 0x1ed   : > { %1342 = vmatpush.msrb.mxu1 %v1283_v3 }
 0x1ee   : > { %1379 = vmatpush.msra.mxu0 %v1290_v56  ;;  %v2469_v56 = vld [vmem:[%s4159_s8 + $0x388] sm:$0xff] }
 0x1f0   : > { %1380 = vmatpush.msra.mxu0 %v1288_v60 }
 0x1f2   : > { %1381 = vmatpush.msra.mxu0 %v1286_v0  ;;  %v2470_v0 = vld [vmem:[%s4159_s8 + $0x390] sm:$0xff] }
 0x1f4   : > { %1382 = vmatpush.msra.mxu0 %v1284_v4 }
 0x226   : > { %v936_v2 = vpop.f32.mrf.mxu0  ;;  %v976_v17 = vpop.f32.mrf.mxu1 }
 0x22f   : > { %v1016_v16 = vpop.f32.mrf.mxu0 }
 0x234   : > { %v956_v26 = vpop.f32.mrf.mxu2  ;;  %v996_v10 = vpop.f32.mrf.mxu3 }
 0x235   : > { %v957_v28 = vadd.f32 %v956_v26, %v936_v2  ;;  %v2419_v2 = vld [vmem:[%s4159_s8 + $0x250] sm:$0xff]  ;;  %v997_v19 = vadd.f32 %v996_v10, %v976_v17  ;;  %v2465_v17 = vld [vmem:[%s4159_s8 + $0x368] sm:$0xff]  ;;  %v2459_v10 = vld [vmem:[%s4159_s8 + $0x338] sm:$0xff] }
 0x237   : > { %v1017_v31 = vadd.f32 %v1016_v16, %v957_v28  ;;  %v1101_v32 = vpop.f32.mrf.mxu0  ;;  %v1056_v16 = vpop.f32.mrf.mxu1  ;;  %v1273_v28 = vperm.slane %v1271_v22, 0  ;;  %v2466_v22 = vld [vmem:[%s4159_s8 + $0x370] sm:$0xff] }
 0x238   : > { %1205 = vmatmul.f32.vlgmr.msra.gmra.mxu1 %v1101_v32  ;;  %1245 = vmatmul.f32.vlgmr.msrb.gmra.mxu0 %v1101_v32  ;;  %v1057_v20 = vadd.f32 %v1056_v16, %v997_v19  ;;  %v2449_v16 = vld [vmem:[%s4159_s8 + $0x2e8] sm:$0xff] }
 0x239   : > { %1521 = vmatpush.msra.mxu1 %v2424_v7  ;;  %v2467_v7 = vld [vmem:[%s4159_s8 + $0x378] sm:$0xff] }
 0x23b   : > { %1522 = vmatpush.msra.mxu1 %v2422_v9  ;;  %v2461_v9 = vld [vmem:[%s4159_s8 + $0x348] sm:$0xff] }
 0x23c   : > { %v1036_v37 = vpop.f32.mrf.mxu2  ;;  %v1076_v18 = vpop.f32.mrf.mxu3 }
 0x23d   : > { %v3479_v40 = vadd.f32 %v1036_v37, %v1017_v31  ;;  %1523 = vmatpush.msra.mxu1 %v2420_v12  ;;  %v1077_v24 = vadd.f32 %v1076_v18, %v1057_v20  ;;  %v2416_v37 = vld [vmem:[%s4159_s8 + $0x238] sm:$0xff] }
 0x23e   : > { %v2455_v12 = vld [vmem:[%s4159_s8 + $0x318] sm:$0xff] }
 0x23f   : > { %1524 = vmatpush.msra.mxu1 %v2418_v15  ;;  %v2451_v15 = vld [vmem:[%s4159_s8 + $0x2f8] sm:$0xff] }
 0x240   : > { %v2447_v18 = vld [vmem:[%s4159_s8 + $0x2d8] sm:$0xff] }
 0x244   : > { %v1121_v44 = vpop.f32.mrf.mxu2 }
 0x245   : > { %1225 = vmatmul.f32.vlgmr.msra.gmra.mxu3 %v1121_v44  ;;  %1265 = vmatmul.f32.vlgmr.msra.gmra.mxu2 %v1121_v44  ;;  %v2402_v44 = vld [vmem:[%s4159_s8 + $0x1c8] sm:$0xff] }
 0x246   : > { %1449 = vmatpush.msra.mxu3 %v2415_v43  ;;  %1481 = vmatpush.msra.mxu2 %v2423_v58  ;;  %v2404_v43 = vld [vmem:[%s4159_s8 + $0x1d8] sm:$0xff] }
 0x248   : > { %1450 = vmatpush.msra.mxu3 %v2413_v45  ;;  %1482 = vmatpush.msra.mxu2 %v2421_v62  ;;  %v2400_v45 = vld [vmem:[%s4159_s8 + $0x1b8] sm:$0xff]  ;;  %v2474_v62 = vld [vmem:[%s4159_s8 + $0x3b0] sm:$0xff] }
 0x24a   : > { %1451 = vmatpush.msra.mxu3 %v2411_v46  ;;  %1483 = vmatpush.msra.mxu2 %v2419_v2  ;;  %v2398_v46 = vld [vmem:[%s4159_s8 + $0x1a8] sm:$0xff]  ;;  %v2468_v2 = vld [vmem:[%s4159_s8 + $0x380] sm:$0xff] }
 0x24c   : > { %1452 = vmatpush.msra.mxu3 %v2409_v47  ;;  %1484 = vmatpush.msra.mxu2 %v2417_v6  ;;  %v2396_v47 = vld [vmem:[%s4159_s8 + $0x198] sm:$0xff] }
 0x24e   : > { %1453 = vmatpush.msra.mxu3 %v2407_v48  ;;  %v2394_v48 = vld [vmem:[%s4159_s8 + $0x188] sm:$0xff] }
 0x250   : > { %1454 = vmatpush.msra.mxu3 %v2405_v49  ;;  %v2392_v49 = vld [vmem:[%s4159_s8 + $0x178] sm:$0xff] }
 0x252   : > { %1455 = vmatpush.msra.mxu3 %v2403_v50  ;;  %v2390_v50 = vld [vmem:[%s4159_s8 + $0x168] sm:$0xff] }
 0x254   : > { %1456 = vmatpush.msra.mxu3 %v2401_v53  ;;  %v2475_v53 = vld [vmem:[%s4159_s8 + $0x3b8] sm:$0xff] }
 0x256   : > { %1457 = vmatpush.msra.mxu3 %v2399_v57 }
 0x258   : > { %1458 = vmatpush.msra.mxu3 %v2397_v61  ;;  %v1407_v61 = vld [vmem:[%s4158_s7] sm:$0xff] }
 0x25a   : > { %1459 = vmatpush.msra.mxu3 %v2395_v1 }
 0x25c   : > { %1460 = vmatpush.msra.mxu3 %v2393_v5 }
 0x25e   : > { %1461 = vmatpush.msra.mxu3 %v2391_v13  ;;  %v2427_v13 = vld [vmem:[%s4158_s7 + $0x8] sm:$0xff] }
 0x260   : > { %1462 = vmatpush.msra.mxu3 %v2389_v8  ;;  %v2463_v8 = vld [vmem:[%s4159_s8 + $0x358] sm:$0xff] }
 0x262   : > { %1463 = vmatpush.msra.mxu3 %v2387_v11  ;;  %v2457_v11 = vld [vmem:[%s4159_s8 + $0x328] sm:$0xff] }
 0x264   : > { %1464 = vmatpush.msra.mxu3 %v2385_v14  ;;  %v2453_v14 = vld [vmem:[%s4159_s8 + $0x308] sm:$0xff] }
 0x2b5   : > { %v1206_v21 = vpop.f32.mrf.mxu1  ;;  %v1246_v23 = vpop.f32.mrf.mxu0 }
 0x2c8   : > { %v1226_v25 = vpop.f32.mrf.mxu3  ;;  %v1266_v26 = vpop.f32.mrf.mxu2 }
 0x2c9   : > { %v1227_v27 = vadd.f32 %v1226_v25, %v1206_v21  ;;  %v1267_v29 = vadd.f32 %v1266_v26, %v1246_v23  ;;  %v2445_v23 = vld [vmem:[%s4159_s8 + $0x2c8] sm:$0xff]  ;;  %v2443_v25 = vld [vmem:[%s4159_s8 + $0x2b8] sm:$0xff]  ;;  %v2462_v26 = vld [vmem:[%s4159_s8 + $0x350] sm:$0xff] }
 0x2cb   : > { %v1269_v31 = vadd.f32 %v1227_v27, %v3479_v40  ;;  %v1270_v32 = vadd.f32 %v1267_v29, %v1077_v24  ;;  %v2410_v40 = vld [vmem:[%s4159_s8 + $0x208] sm:$0xff]  ;;  %v2464_v24 = vld [vmem:[%s4159_s8 + $0x360] sm:$0xff]  ;;  %v2439_v29 = vld [vmem:[%s4159_s8 + $0x298] sm:$0xff] }
 0x2cc   : > { %v2441_v27 = vld [vmem:[%s4159_s8 + $0x2a8] sm:$0xff] }
 0x2cd   : > { %v1277_v33 = vadd.f32 %v1273_v28, %v1269_v31  ;;  %v1278_v34 = vadd.f32 %v1274_v30, %v1270_v32  ;;  %v2460_v28 = vld [vmem:[%s4159_s8 + $0x340] sm:$0xff]  ;;  %v2458_v30 = vld [vmem:[%s4159_s8 + $0x330] sm:$0xff]  ;;  %v2437_v31 = vld [vmem:[%s4159_s8 + $0x288] sm:$0xff] }
 0x2ce   : > { %v2456_v32 = vld [vmem:[%s4159_s8 + $0x320] sm:$0xff] }
 0x2cf   : > { %v3596_v35 = vclamps-f32 %v1277_v33, 1.0  ;;  %v3598_v36 = vclamps-f32 %v1278_v34, 1.0  ;;  %v2454_v33 = vld [vmem:[%s4159_s8 + $0x310] sm:$0xff]  ;;  %v2452_v34 = vld [vmem:[%s4159_s8 + $0x300] sm:$0xff] }
 0x2d1   : > { %1343 = vmatmul.f32.vlgmr.msrb.gmra.mxu1 %v3596_v35  ;;  %2383 = vmatmul.msk.f32.vlgmr.msrb.gmra.mxu3 %vm1323_vm3, %v3598_v36 }
 0x2d2   : > { %1383 = vmatmul.f32.vlgmr.msra.gmra.mxu0 %v3596_v35  ;;  %2384 = vmatmul.msk.f32.vlgmr.msrb.gmra.mxu2 %vm1323_vm3, %v3598_v36 }
 0x2d3   : > { %1489 = vmatpush.msrb.mxu2 %v2416_v37  ;;  %v2448_v37 = vld [vmem:[%s4159_s8 + $0x2e0] sm:$0xff] }
 0x2d5   : > { %1490 = vmatpush.msrb.mxu2 %v2414_v38  ;;  %v2446_v38 = vld [vmem:[%s4159_s8 + $0x2d0] sm:$0xff] }
 0x2d7   : > { %1491 = vmatpush.msrb.mxu2 %v2412_v39  ;;  %v2444_v39 = vld [vmem:[%s4159_s8 + $0x2c0] sm:$0xff] }
 0x2d9   : > { %1492 = vmatpush.msrb.mxu2 %v2410_v40  ;;  %1465 = vmatmul.f32.vlgmr.msra.gmra.mxu3 %v3596_v35  ;;  %v2442_v40 = vld [vmem:[%s4159_s8 + $0x2b0] sm:$0xff] }
 0x2da   : > { %2425 = vmatmul.msk.f32.vlgmr.msra.gmra.mxu2 %vm1323_vm3, %v3598_v36  ;;  %2426 = vmatmul.msk.f32.vlgmr.msra.gmra.mxu1 %vm1323_vm3, %v3598_v36 }
 0x2db   : > { %1493 = vmatpush.msrb.mxu2 %v2408_v41  ;;  %v2440_v41 = vld [vmem:[%s4159_s8 + $0x2a0] sm:$0xff] }
 0x2dd   : > { %1494 = vmatpush.msrb.mxu2 %v2406_v42  ;;  %v2438_v42 = vld [vmem:[%s4159_s8 + $0x290] sm:$0xff] }
 0x2df   : > { %1495 = vmatpush.msrb.mxu2 %v2404_v43  ;;  %v2436_v43 = vld [vmem:[%s4159_s8 + $0x280] sm:$0xff] }
 0x2e1   : > { %1496 = vmatpush.msrb.mxu2 %v2402_v44 }
 0x2e3   : > { %1497 = vmatpush.msrb.mxu2 %v2400_v45 }
 0x2e5   : > { %1498 = vmatpush.msrb.mxu2 %v2398_v46 }
 0x2e7   : > { %1499 = vmatpush.msrb.mxu2 %v2396_v47 }
 0x2e9   : > { %1500 = vmatpush.msrb.mxu2 %v2394_v48 }
 0x2eb   : > { %1501 = vmatpush.msrb.mxu2 %v2392_v49 }
 0x2ed   : > { %1502 = vmatpush.msrb.mxu2 %v2390_v50  ;;  %v2516_v50 = vld [vmem:[%s4162_s11 + $0x1f8] sm:$0xff] }
 0x2ef   : > { %1503 = vmatpush.msrb.mxu2 %v2388_v51  ;;  %v2515_v51 = vld [vmem:[%s4162_s11 + $0x1f0] sm:$0xff] }
 0x2f1   : > { %1504 = vmatpush.msrb.mxu2 %v2386_v52  ;;  %v2513_v52 = vld [vmem:[%s4162_s11 + $0x1e0] sm:$0xff] }
 0x2f2   : > { %1505 = vmatmul.f32.vlgmr.msrb.gmra.mxu2 %v3596_v35 }
 0x2f3   : > { %1744 = vmatpush.msra.mxu2 %v2475_v53 }
 0x2f5   : > { %1745 = vmatpush.msra.mxu2 %v2473_v54 }
 0x2f7   : > { %1746 = vmatpush.msra.mxu2 %v2471_v55  ;;  %v2512_v55 = vld [vmem:[%s4162_s11 + $0x1d8] sm:$0xff] }
 0x2f9   : > { %1747 = vmatpush.msra.mxu2 %v2469_v56 }
 0x2fa   : > { %2477 = vmatmul.msk.f32.vlgmr.msra.gmra.mxu2 %vm1323_vm3, %v3598_v36 }
 0x34e   : > { %v1344_v57 = vpop.f32.mrf.mxu1 }
 0x34f   : > { %v1384_v4 = vpop.f32.mrf.mxu0 }
 0x354   : > { %v1364_v58 = vpop.f32.mrf.mxu3 }
 0x355   : > { %v1365_v59 = vadd.f32 %v1364_v58, %v1344_v57  ;;  %v1404_v60 = vpop.f32.mrf.mxu2  ;;  %v2478_v57 = vld [vmem:[%s4158_s7 + $0x10] sm:$0xff]  ;;  %v1848_v58 = vld [vmem:[%s4162_s11 + $0xf8] sm:$0xff] }
 0x356   : > { %v1405_v6 = vadd.f32 %v1404_v60, %v1384_v4  ;;  %v2500_v60 = vld [vmem:[%s4162_s11 + $0x178] sm:$0xff]  ;;  %v2507_v4 = vld [vmem:[%s4162_s11 + $0x1b0] sm:$0xff] }
 0x357   : > { %2432 = vmatpush.msk.msrb.mxu3 %vm1535_vm4, %v1365_v59  ;;  %v1526_v19 = vpop.f32.mrf.mxu1  ;;  %v2511_v59 = vld [vmem:[%s4162_s11 + $0x1d0] sm:$0xff] }
 0x358   : > { %2433 = vmatmul.msk.f32.vlgmr.msrb.gmra.mxu3 %vm1531_vm5, %v1407_v61 }
 0x359   : > { %1704 = vmatpush.msra.mxu3 %v2474_v62  ;;  %v2510_v62 = vld [vmem:[%s4162_s11 + $0x1c8] sm:$0xff] }
 0x35b   : > { %1705 = vmatpush.msra.mxu3 %v2472_v63  ;;  %v1846_v63 = vld [vmem:[%s4162_s11 + $0xe8] sm:$0xff] }
 0x35c   : > { %v1466_v1 = vpop.f32.mrf.mxu3 }
 0x35d   : > { %v1486_v3 = vpop.f32.mrf.mxu2  ;;  %1706 = vmatpush.msra.mxu3 %v2470_v0  ;;  %v2509_v0 = vld [vmem:[%s4162_s11 + $0x1c0] sm:$0xff] }
 0x35e   : > { %v1487_v5 = vadd.f32 %v1486_v3, %v1466_v1  ;;  %v1845_v1 = vld [vmem:[%s4162_s11 + $0xe0] sm:$0xff]  ;;  %v1844_v3 = vld [vmem:[%s4162_s11 + $0xd8] sm:$0xff] }
 0x35f   : > { %1707 = vmatpush.msra.mxu3 %v2468_v2  ;;  %v2508_v2 = vld [vmem:[%s4162_s11 + $0x1b8] sm:$0xff] }
 0x360   : > { %2428 = vmatpush.msk.msrb.mxu0 %vm1535_vm4, %v1487_v5  ;;  %2476 = vmatmul.msk.f32.vlgmr.msra.gmra.mxu3 %vm1323_vm3, %v3598_v36  ;;  %v2450_v36 = vld [vmem:[%s4159_s8 + $0x2f0] sm:$0xff] }
 0x361   : > { %2429 = vmatmul.msk.f32.vlgmr.msrb.gmra.mxu0 %vm1531_vm5, %v2427_v13  ;;  %v1843_v5 = vld [vmem:[%s4162_s11 + $0xd0] sm:$0xff] }
 0x362   : > { %2434 = vmatpush.msk.msra.mxu0 %vm1535_vm4, %v1405_v6  ;;  %v2506_v6 = vld [vmem:[%s4162_s11 + $0x1a8] sm:$0xff] }
 0x364   : > { %1712 = vmatpush.msrb.mxu0 %v2467_v7  ;;  %v2505_v7 = vld [vmem:[%s4162_s11 + $0x1a0] sm:$0xff] }
 0x366   : > { %1713 = vmatpush.msrb.mxu0 %v2465_v17  ;;  %v1841_v17 = vld [vmem:[%s4162_s11 + $0xc0] sm:$0xff] }
 0x368   : > { %1714 = vmatpush.msrb.mxu0 %v2463_v8  ;;  %v1840_v8 = vld [vmem:[%s4162_s11 + $0xb8] sm:$0xff] }
 0x369   : > { %2435 = vmatmul.msk.f32.vlgmr.msra.gmra.mxu0 %vm1531_vm5, %v1407_v61  ;;  %v1847_v61 = vld [vmem:[%s4162_s11 + $0xf0] sm:$0xff] }
 0x36a   : > { %1715 = vmatpush.msrb.mxu0 %v2461_v9  ;;  %v1839_v9 = vld [vmem:[%s4162_s11 + $0xb0] sm:$0xff] }
 0x36c   : > { %1716 = vmatpush.msrb.mxu0 %v2459_v10 }
 0x36e   : > { %1717 = vmatpush.msrb.mxu0 %v2457_v11 }
 0x370   : > { %1718 = vmatpush.msrb.mxu0 %v2455_v12  ;;  %v1838_v12 = vld [vmem:[%s4162_s11 + $0xa8] sm:$0xff] }
 0x372   : > { %1719 = vmatpush.msrb.mxu0 %v2453_v14 }
 0x374   : > { %1720 = vmatpush.msrb.mxu0 %v2451_v15  ;;  %v1832_v15 = vld [vmem:[%s4162_s11 + $0x78] sm:$0xff] }
 0x375   : > { %v1506_v20 = vpop.f32.mrf.mxu2 }
 0x376   : > { %1721 = vmatpush.msrb.mxu0 %v2449_v16  ;;  %v1527_v21 = vadd.f32 %v1526_v19, %v1506_v20  ;;  %v1837_v16 = vld [vmem:[%s4162_s11 + $0xa0] sm:$0xff]  ;;  %v1836_v19 = vld [vmem:[%s4162_s11 + $0x98] sm:$0xff]  ;;  %v2499_v20 = vld [vmem:[%s4162_s11 + $0x170] sm:$0xff] }
 0x378   : > { %1722 = vmatpush.msrb.mxu0 %v2447_v18  ;;  %2430 = vmatpush.msk.msrb.mxu1 %vm1535_vm4, %v1527_v21  ;;  %v1831_v18 = vld [vmem:[%s4162_s11 + $0x70] sm:$0xff]  ;;  %v2504_v21 = vld [vmem:[%s4162_s11 + $0x198] sm:$0xff] }
 0x379   : > { %2431 = vmatmul.msk.f32.vlgmr.msrb.gmra.mxu1 %vm1531_vm5, %v2427_v13  ;;  %v1842_v13 = vld [vmem:[%s4162_s11 + $0xc8] sm:$0xff] }
 0x37a   : > { %1672 = vmatpush.msra.mxu1 %v2466_v22  ;;  %1723 = vmatpush.msrb.mxu0 %v2445_v23  ;;  %v1830_v22 = vld [vmem:[%s4162_s11 + $0x68] sm:$0xff]  ;;  %v1835_v23 = vld [vmem:[%s4162_s11 + $0x90] sm:$0xff] }
 0x37c   : > { %1673 = vmatpush.msra.mxu1 %v2464_v24  ;;  %1724 = vmatpush.msrb.mxu0 %v2443_v25  ;;  %v2498_v24 = vld [vmem:[%s4162_s11 + $0x168] sm:$0xff]  ;;  %v2503_v25 = vld [vmem:[%s4162_s11 + $0x190] sm:$0xff] }
 0x37d   : > { %v1749_v53 = vpop.f32.mrf.mxu2 }
 0x37e   : > { %1674 = vmatpush.msra.mxu1 %v2462_v26  ;;  %1725 = vmatpush.msrb.mxu0 %v2441_v27  ;;  %v1829_v26 = vld [vmem:[%s4162_s11 + $0x60] sm:$0xff]  ;;  %v1834_v27 = vld [vmem:[%s4162_s11 + $0x88] sm:$0xff] }
 0x380   : > { %1675 = vmatpush.msra.mxu1 %v2460_v28  ;;  %1726 = vmatpush.msrb.mxu0 %v2439_v29  ;;  %v2497_v28 = vld [vmem:[%s4162_s11 + $0x160] sm:$0xff]  ;;  %v2502_v29 = vld [vmem:[%s4162_s11 + $0x188] sm:$0xff] }
 0x382   : > { %1676 = vmatpush.msra.mxu1 %v2458_v30  ;;  %1727 = vmatpush.msrb.mxu0 %v2437_v31  ;;  %v1828_v30 = vld [vmem:[%s4162_s11 + $0x58] sm:$0xff]  ;;  %v1833_v31 = vld [vmem:[%s4162_s11 + $0x80] sm:$0xff] }
 0x383   : > { %1728 = vmatmul.f32.vlgmr.msrb.gmra.mxu0 %v3596_v35 }
 0x384   : > { %1677 = vmatpush.msra.mxu1 %v2456_v32  ;;  %1944 = vmatpush.msra.mxu0 %v2516_v50  ;;  %v2496_v32 = vld [vmem:[%s4162_s11 + $0x158] sm:$0xff]  ;;  %v2489_v50 = vld [vmem:[%s4162_s11 + $0x120] sm:$0xff] }
 0x386   : > { %1678 = vmatpush.msra.mxu1 %v2454_v33  ;;  %1945 = vmatpush.msra.mxu0 %v2515_v51  ;;  %v2501_v33 = vld [vmem:[%s4162_s11 + $0x180] sm:$0xff]  ;;  %v1820_v51 = vld [vmem:[%s4162_s11 + $0x18] sm:$0xff] }
 0x388   : > { %1679 = vmatpush.msra.mxu1 %v2452_v34  ;;  %v1827_v34 = vld [vmem:[%s4162_s11 + $0x50] sm:$0xff] }
 0x38a   : > { %1680 = vmatpush.msra.mxu1 %v2450_v36  ;;  %v2495_v36 = vld [vmem:[%s4162_s11 + $0x150] sm:$0xff] }
 0x38c   : > { %1681 = vmatpush.msra.mxu1 %v2448_v37  ;;  %v1826_v37 = vld [vmem:[%s4162_s11 + $0x48] sm:$0xff] }
 0x38e   : > { %1682 = vmatpush.msra.mxu1 %v2446_v38  ;;  %v2494_v38 = vld [vmem:[%s4162_s11 + $0x148] sm:$0xff] }
 0x390   : > { %1683 = vmatpush.msra.mxu1 %v2444_v39  ;;  %v1825_v39 = vld [vmem:[%s4162_s11 + $0x40] sm:$0xff] }
 0x392   : > { %1684 = vmatpush.msra.mxu1 %v2442_v40  ;;  %v2493_v40 = vld [vmem:[%s4162_s11 + $0x140] sm:$0xff] }
 0x394   : > { %1685 = vmatpush.msra.mxu1 %v2440_v41  ;;  %v1824_v41 = vld [vmem:[%s4162_s11 + $0x38] sm:$0xff] }
 0x396   : > { %1686 = vmatpush.msra.mxu1 %v2438_v42  ;;  %v2492_v42 = vld [vmem:[%s4162_s11 + $0x138] sm:$0xff] }
 0x398   : > { %1687 = vmatpush.msra.mxu1 %v2436_v43  ;;  %v1823_v43 = vld [vmem:[%s4162_s11 + $0x30] sm:$0xff] }
 0x399   : > { %1688 = vmatmul.f32.vlgmr.msra.gmra.mxu1 %v3596_v35  ;;  %v2514_v35 = vld [vmem:[%s4162_s11 + $0x1e8] sm:$0xff] }
 0x39a   : > { %1946 = vmatpush.msra.mxu0 %v2514_v35  ;;  %1924 = vmatpush.msrb.mxu1 %v2500_v60  ;;  %v2488_v35 = vld [vmem:[%s4162_s11 + $0x118] sm:$0xff] }
 0x39c   : > { %1947 = vmatpush.msra.mxu0 %v2513_v52  ;;  %1925 = vmatpush.msrb.mxu1 %v2499_v20  ;;  %v1819_v52 = vld [vmem:[%s4162_s11 + $0x10] sm:$0xff]  ;;  %v2552_v20 = vld [vmem:[%s4162_s11 + $0x2e8] sm:$0xff] }
 0x39e   : > { %1948 = vmatpush.msra.mxu0 %v2512_v55  ;;  %1926 = vmatpush.msrb.mxu1 %v2498_v24  ;;  %v2486_v55 = vld [vmem:[%s4162_s11 + $0x108] sm:$0xff]  ;;  %v2550_v24 = vld [vmem:[%s4162_s11 + $0x2d8] sm:$0xff] }
 0x3a0   : > { %1949 = vmatpush.msra.mxu0 %v2511_v59  ;;  %1927 = vmatpush.msrb.mxu1 %v2497_v28  ;;  %v2529_v28 = vld [vmem:[%s4162_s11 + $0x230] sm:$0xff] }
 0x3a2   : > { %1950 = vmatpush.msra.mxu0 %v2510_v62  ;;  %1928 = vmatpush.msrb.mxu1 %v2496_v32  ;;  %v2527_v32 = vld [vmem:[%s4162_s11 + $0x220] sm:$0xff] }
 0x3a4   : > { %1951 = vmatpush.msra.mxu0 %v2509_v0  ;;  %1929 = vmatpush.msrb.mxu1 %v2495_v36  ;;  %v2545_v36 = vld [vmem:[%s4162_s11 + $0x2b0] sm:$0xff] }
 0x3a6   : > { %1952 = vmatpush.msra.mxu0 %v2508_v2  ;;  %1930 = vmatpush.msrb.mxu1 %v2494_v38  ;;  %v2544_v38 = vld [vmem:[%s4162_s11 + $0x2a8] sm:$0xff] }
 0x3a8   : > { %1953 = vmatpush.msra.mxu0 %v2507_v4  ;;  %1931 = vmatpush.msrb.mxu1 %v2493_v40  ;;  %v2543_v40 = vld [vmem:[%s4162_s11 + $0x2a0] sm:$0xff] }
 0x3aa   : > { %1954 = vmatpush.msra.mxu0 %v2506_v6  ;;  %1932 = vmatpush.msrb.mxu1 %v2492_v42  ;;  %v2542_v42 = vld [vmem:[%s4162_s11 + $0x298] sm:$0xff] }
 0x3ac   : > { %1955 = vmatpush.msra.mxu0 %v2505_v7  ;;  %v2517_v7 = vld [vmem:[%s4161_s10 + $0x10] sm:$0xff] }
 0x3ae   : > { %1956 = vmatpush.msra.mxu0 %v2504_v21  ;;  %v2532_v21 = vld [vmem:[%s4162_s11 + $0x248] sm:$0xff] }
 0x3b0   : > { %1957 = vmatpush.msra.mxu0 %v2503_v25  ;;  %v1890_v25 = vld [vmem:[%s4161_s10 + $0x8] sm:$0xff] }
 0x3b2   : > { %1958 = vmatpush.msra.mxu0 %v2502_v29  ;;  %v2548_v29 = vld [vmem:[%s4162_s11 + $0x2c8] sm:$0xff] }
 0x3b4   : > { %1959 = vmatpush.msra.mxu0 %v2501_v33  ;;  %v2546_v33 = vld [vmem:[%s4162_s11 + $0x2b8] sm:$0xff] }
 0x3db   : > { %v1608_v44 = vpop.f32.mrf.mxu3 }
 0x3de   : > { %v1559_v45 = vpop.f32.mrf.mxu0 }
 0x3df   : > { %v3800_v46 = vadd.f32 %v1608_v44, %v1559_v45  ;;  %v2491_v44 = vld [vmem:[%s4162_s11 + $0x130] sm:$0xff]  ;;  %v1822_v45 = vld [vmem:[%s4162_s11 + $0x28] sm:$0xff] }
 0x3e0   : > { %1933 = vmatpush.msrb.mxu1 %v2491_v44  ;;  %v2540_v44 = vld [vmem:[%s4162_s11 + $0x288] sm:$0xff] }
 0x3e3   : > { %v1709_v10 = vpop.f32.mrf.mxu3 }
 0x3e6   : > { %v1628_v47 = vpop.f32.mrf.mxu0 }
 0x3f6   : > { %v1579_v48 = vpop.f32.mrf.mxu1 }
 0x3f7   : > { %v3802_v49 = vadd.f32 %v1628_v47, %v1579_v48  ;;  %v2490_v47 = vld [vmem:[%s4162_s11 + $0x128] sm:$0xff]  ;;  %v1821_v48 = vld [vmem:[%s4162_s11 + $0x20] sm:$0xff] }
 0x3f8   : > { %1934 = vmatpush.msrb.mxu1 %v2490_v47 }
 0x3fa   : > { %1935 = vmatpush.msrb.mxu1 %v2489_v50 }
 0x3fc   : > { %1936 = vmatpush.msrb.mxu1 %v2488_v35 }
 0x400   : > { %v1729_v54 = vpop.f32.mrf.mxu0 }
 0x401   : > { %v1750_v56 = vadd.f32 %v1749_v53, %v1729_v54  ;;  %v2487_v53 = vld [vmem:[%s4162_s11 + $0x110] sm:$0xff]  ;;  %v1818_v54 = vld [vmem:[%s4162_s11 + $0x8] sm:$0xff] }
 0x402   : > { %1937 = vmatpush.msrb.mxu1 %v2487_v53 }
 0x403   : > { %2481 = vmatpush.msk.msrb.mxu2 %vm1535_vm4, %v1750_v56  ;;  %v1817_v56 = vld [vmem:[%s4162_s11] sm:$0xff] }
 0x404   : > { %2482 = vmatmul.msk.f32.vlgmr.msrb.gmra.mxu2 %vm1531_vm5, %v2478_v57  ;;  %1938 = vmatpush.msrb.mxu1 %v2486_v55 }
 0x405   : > { %1869 = vmatpush.msra.mxu2 %v1848_v58  ;;  %v1805_v58 = vld [vmem:[%s4160_s9] sm:$0x3] }
 0x406   : > { %v1808_v59 = vperm.slane %v1805_v58, 1  ;;  %v1807_v0 = vperm.slane %v1805_v58, 0  ;;  %v2573_v58 = vld [vmem:[%s4163_s12] ss:$0 sm:$0xff] }
 0x407   : > { %1870 = vmatpush.msra.mxu2 %v1847_v61 }
 0x409   : > { %1871 = vmatpush.msra.mxu2 %v1846_v63 }
 0x40b   : > { %1872 = vmatpush.msra.mxu2 %v1845_v1 }
 0x40d   : > { %1873 = vmatpush.msra.mxu2 %v1844_v3 }
 0x40f   : > { %1874 = vmatpush.msra.mxu2 %v1843_v5 }
 0x411   : > { %1875 = vmatpush.msra.mxu2 %v1842_v13  ;;  %v2538_v13 = vld [vmem:[%s4162_s11 + $0x278] sm:$0xff] }
 0x413   : > { %1876 = vmatpush.msra.mxu2 %v1841_v17  ;;  %v2536_v17 = vld [vmem:[%s4162_s11 + $0x268] sm:$0xff] }
 0x415   : > { %1877 = vmatpush.msra.mxu2 %v1840_v8 }
 0x416   : > { %v1689_v11 = vpop.f32.mrf.mxu1 }
 0x417   : > { %v1710_v14 = vadd.f32 %v1709_v10, %v1689_v11  ;;  %1878 = vmatpush.msra.mxu2 %v1839_v9  ;;  %v2535_v11 = vld [vmem:[%s4162_s11 + $0x260] sm:$0xff] }
 0x419   : > { %2479 = vmatpush.msk.msrb.mxu3 %vm1535_vm4, %v1710_v14  ;;  %1879 = vmatpush.msra.mxu2 %v1838_v12  ;;  %v2554_v12 = vld [vmem:[%s4162_s11 + $0x2f8] sm:$0xff]  ;;  %v1889_v14 = vld [vmem:[%s4161_s10] sm:$0xff] }
 0x41a   : > { %2480 = vmatmul.msk.f32.vlgmr.msrb.gmra.mxu3 %vm1531_vm5, %v2478_v57  ;;  %v2485_v57 = vld [vmem:[%s4162_s11 + $0x100] sm:$0xff] }
 0x41b   : > { %1849 = vmatpush.msra.mxu3 %v1832_v15  ;;  %1880 = vmatpush.msra.mxu2 %v1837_v16  ;;  %v2534_v15 = vld [vmem:[%s4162_s11 + $0x258] sm:$0xff]  ;;  %v2553_v16 = vld [vmem:[%s4162_s11 + $0x2f0] sm:$0xff] }
 0x41c   : > { %1939 = vmatpush.msrb.mxu1 %v2485_v57  ;;  %v2556_v57 = vld [vmem:[%s4161_s10 + $0x28] sm:$0xff] }
 0x41d   : > { %1850 = vmatpush.msra.mxu3 %v1831_v18  ;;  %1881 = vmatpush.msra.mxu2 %v1836_v19  ;;  %v2518_v18 = vld [vmem:[%s4161_s10 + $0x18] sm:$0xff]  ;;  %v2533_v19 = vld [vmem:[%s4162_s11 + $0x250] sm:$0xff] }
 0x41f   : > { %1851 = vmatpush.msra.mxu3 %v1830_v22  ;;  %1882 = vmatpush.msra.mxu2 %v1835_v23  ;;  %v2551_v22 = vld [vmem:[%s4162_s11 + $0x2e0] sm:$0xff] }
 0x420   : > { %v2531_v23 = vld [vmem:[%s4162_s11 + $0x240] sm:$0xff] }
 0x421   : > { %1852 = vmatpush.msra.mxu3 %v1829_v26  ;;  %1883 = vmatpush.msra.mxu2 %v1834_v27  ;;  %v2530_v26 = vld [vmem:[%s4162_s11 + $0x238] sm:$0xff]  ;;  %v2549_v27 = vld [vmem:[%s4162_s11 + $0x2d0] sm:$0xff] }
 0x423   : > { %1853 = vmatpush.msra.mxu3 %v1828_v30  ;;  %1884 = vmatpush.msra.mxu2 %v1833_v31  ;;  %v2528_v30 = vld [vmem:[%s4162_s11 + $0x228] sm:$0xff]  ;;  %v2547_v31 = vld [vmem:[%s4162_s11 + $0x2c0] sm:$0xff] }
 0x425   : > { %1854 = vmatpush.msra.mxu3 %v1827_v34  ;;  %v2526_v34 = vld [vmem:[%s4162_s11 + $0x218] sm:$0xff] }
 0x427   : > { %1855 = vmatpush.msra.mxu3 %v1826_v37  ;;  %v2525_v37 = vld [vmem:[%s4162_s11 + $0x210] sm:$0xff] }
 0x429   : > { %1856 = vmatpush.msra.mxu3 %v1825_v39  ;;  %v2524_v39 = vld [vmem:[%s4162_s11 + $0x208] sm:$0xff] }
 0x42b   : > { %1857 = vmatpush.msra.mxu3 %v1824_v41  ;;  %v2523_v41 = vld [vmem:[%s4162_s11 + $0x200] sm:$0xff] }
 0x42d   : > { %1858 = vmatpush.msra.mxu3 %v1823_v43  ;;  %v2541_v43 = vld [vmem:[%s4162_s11 + $0x290] sm:$0xff] }
 0x42f   : > { %1859 = vmatpush.msra.mxu3 %v1822_v45  ;;  %v2539_v45 = vld [vmem:[%s4162_s11 + $0x280] sm:$0xff] }
 0x431   : > { %1860 = vmatpush.msra.mxu3 %v1821_v48 }
 0x433   : > { %1861 = vmatpush.msra.mxu3 %v1820_v51 }
 0x435   : > { %1862 = vmatpush.msra.mxu3 %v1819_v52 }
 0x437   : > { %1863 = vmatpush.msra.mxu3 %v1818_v54 }
 0x439   : > { %1864 = vmatpush.msra.mxu3 %v1817_v56  ;;  %v2555_v56 = vld [vmem:[%s4161_s10 + $0x20] sm:$0xff] }
 0x487   : > { %v1800_v60 = vpop.f32.mrf.mxu2 }
 0x488   : > { %v1804_v61 = vadd.f32 %v1800_v60, %v3802_v49 }
 0x48a   : > { %v1812_v62 = vadd.f32 %v1808_v59, %v1804_v61 }
 0x48c   : > { %v4007_v63 = vclamps-f32 %v1812_v62, 1.0 }
 0x48e   : > { %1885 = vmatmul.f32.vlgmr.msra.gmra.mxu2 %v4007_v63  ;;  %1960 = vmatmul.f32.vlgmr.msra.gmra.mxu0 %v4007_v63 }
 0x49d   : > { %v1780_v1 = vpop.f32.mrf.mxu3 }
 0x49e   : > { %v1803_v2 = vadd.f32 %v1780_v1, %v3800_v46  ;;  %v2537_v46 = vld [vmem:[%s4162_s11 + $0x270] sm:$0xff] }
 0x4a0   : > { %v1811_v3 = vadd.f32 %v1807_v0, %v1803_v2 }
 0x4a2   : > { %v4012_v4 = vclamps-f32 %v1811_v3, 1.0 }
 0x4a4   : > { %1865 = vmatmul.f32.vlgmr.msra.gmra.mxu3 %v4012_v4  ;;  %1940 = vmatmul.f32.vlgmr.msrb.gmra.mxu1 %v4012_v4 }
 0x50b   : > { %v1961_v5 = vpop.f32.mrf.mxu0 }
 0x511   : > { %v1886_v8 = vpop.f32.mrf.mxu2 }
 0x521   : > { %v1941_v49 = vpop.f32.mrf.mxu1 }
 0x522   : > { %v1962_v6 = vadd.f32 %v1961_v5, %v1941_v49 }
 0x524   : > { %1988 = vmatpush.msrb.mxu3 %v1962_v6 }
 0x525   : > { %2519 = vmatmul.msk.f32.vlgmr.msrb.gmra.mxu3 %vm701_vm2, %v2517_v7 }
 0x526   : > { %2058 = vmatpush.msra.mxu3 %v2538_v13 }
 0x527   : > { %v1866_v9 = vpop.f32.mrf.mxu3 }
 0x528   : > { %2059 = vmatpush.msra.mxu3 %v2537_v46  ;;  %v1887_v10 = vadd.f32 %v1886_v8, %v1866_v9 }
 0x52a   : > { %2060 = vmatpush.msra.mxu3 %v2536_v17  ;;  %2017 = vmatpush.msrb.mxu2 %v1887_v10 }
 0x52b   : > { %2521 = vmatmul.msk.f32.vlgmr.msrb.gmra.mxu2 %vm701_vm2, %v1889_v14 }
 0x52c   : > { %2061 = vmatpush.msra.mxu3 %v2535_v11  ;;  %2078 = vmatpush.msra.mxu2 %v2554_v12 }
 0x52d   : > { %2520 = vmatmul.msk.f32.gmra.mxu3 %vm701_vm2, %v2518_v18 }
 0x52e   : > { %2062 = vmatpush.msra.mxu3 %v2534_v15  ;;  %2079 = vmatpush.msra.mxu2 %v2553_v16 }
 0x530   : > { %2063 = vmatpush.msra.mxu3 %v2533_v19  ;;  %2080 = vmatpush.msra.mxu2 %v2552_v20 }
 0x532   : > { %2064 = vmatpush.msra.mxu3 %v2532_v21  ;;  %2081 = vmatpush.msra.mxu2 %v2551_v22 }
 0x533   : > { %2522 = vmatmul.msk.f32.gmra.mxu2 %vm701_vm2, %v1890_v25 }
 0x534   : > { %2065 = vmatpush.msra.mxu3 %v2531_v23  ;;  %2082 = vmatpush.msra.mxu2 %v2550_v24 }
 0x536   : > { %2066 = vmatpush.msra.mxu3 %v2530_v26  ;;  %2083 = vmatpush.msra.mxu2 %v2549_v27 }
 0x538   : > { %2067 = vmatpush.msra.mxu3 %v2529_v28  ;;  %2084 = vmatpush.msra.mxu2 %v2548_v29 }
 0x53a   : > { %2068 = vmatpush.msra.mxu3 %v2528_v30  ;;  %2085 = vmatpush.msra.mxu2 %v2547_v31 }
 0x53c   : > { %2069 = vmatpush.msra.mxu3 %v2527_v32  ;;  %2086 = vmatpush.msra.mxu2 %v2546_v33 }
 0x53e   : > { %2070 = vmatpush.msra.mxu3 %v2526_v34  ;;  %2087 = vmatpush.msra.mxu2 %v2545_v36 }
 0x540   : > { %2071 = vmatpush.msra.mxu3 %v2525_v37  ;;  %2088 = vmatpush.msra.mxu2 %v2544_v38 }
 0x542   : > { %2072 = vmatpush.msra.mxu3 %v2524_v39  ;;  %2089 = vmatpush.msra.mxu2 %v2543_v40 }
 0x544   : > { %2073 = vmatpush.msra.mxu3 %v2523_v41  ;;  %2090 = vmatpush.msra.mxu2 %v2542_v42 }
 0x545   : > { %2074 = vmatmul.f32.vlgmr.msra.gmra.mxu3 %v4012_v4 }
 0x546   : > { %2091 = vmatpush.msra.mxu2 %v2541_v43 }
 0x548   : > { %2092 = vmatpush.msra.mxu2 %v2540_v44 }
 0x54a   : > { %2093 = vmatpush.msra.mxu2 %v2539_v45 }
 0x54b   : > { %2094 = vmatmul.f32.vlgmr.msra.gmra.mxu2 %v4007_v63 }
 0x5a8   : > { %v1990_v47 = vpop.f32.mrf.mxu3 }
 0x5ae   : > { %v2019_v48 = vpop.f32.mrf.mxu2 }
 0x5af   : > { %v2020_v50 = vadd.f32 %v2019_v48, %v1990_v47 }
 0x5b0   : > { %v1993_v51 = vpop.f32.mrf.mxu3 }
 0x5b6   : > { %v2022_v35 = vpop.f32.mrf.mxu2 }
 0x5b7   : > { %v2023_v52 = vadd.f32 %v2022_v35, %v1993_v51 }
 0x5c8   : > { %v2075_v53 = vpop.f32.mrf.mxu3 }
 0x5ce   : > { %v2095_v54 = vpop.f32.mrf.mxu2 }
 0x5cf   : > { %v2096_v55 = vadd.f32 %v2095_v54, %v2075_v53 }
 0x5d1   : > { %2122 = vmatpush.msra.mxu1 %v2096_v55 }
 0x5d2   : > { %2557 = vmatmul.msk.f32.vlgmr.msra.gmra.mxu1 %vm701_vm2, %v2555_v56 }
 0x5da   : > { %2558 = vmatmul.msk.f32.gmra.mxu1 %vm701_vm2, %v2556_v57 }
 0x64f   : > { %v2124_v59 = vpop.f32.mrf.mxu1 }
 0x650   : > { %v2130_v60 = vadd.f32 %v2124_v59, %v2020_v50 }
 0x652   : > { %v2136_v61 = vadd.f32 %v2573_v58, %v2130_v60 }
 0x654   : > { %v2559_v62 = vclamps-f32 %v2136_v61, 1.0 }
 0x656   : > { %2142 = vst.msk [vmem:[%s440_s18] sm:$0xff] %vm518_vm1, %v2559_v62 }
 0x657   : > { %v2127_v63 = vpop.f32.mrf.mxu1 }
 0x658   : > { %v2131_v0 = vadd.f32 %v2127_v63, %v2023_v52 }
 0x65a   : > { %v2137_v1 = vadd.f32 %v2573_v58, %v2131_v0 }
 0x65c   : > { %v2560_v2 = vclamps-f32 %v2137_v1, 1.0 }
 0x65e   : > { %2143 = vst.msk [vmem:[%s440_s18 + $0x8] sm:$0xff] %vm518_vm1, %v2560_v2 }
 0x65f PF: > { %s23_s25 = sadd.s32 1, %s2580_s25  }
 0x660   : > { %p20_p4 = scmp.ge.s32.totalorder %s23_s25, 4  }
 0x662   :  { %22 = sbr.rel (!%p20_p4) target bundleno = 1 (0x1), region = 118 }

</bundles_post_ra>
